<compile_context>
chip_gen: v5e
topology: v5e:2x2
jax: 0.10.0
libtpu: 0.0.40
codegen_flags: <defaults>
</compile_context>

<pallas_src>
import math
import jax
import jax.numpy as jnp
from jax.experimental import pallas as pl
from jax.experimental.pallas import tpu as pltpu

_LAYER_DIMS = [(784, 256), (256, 64), (64, 16), (16, 64), (64, 256), (256, 784)]
_FEATURES = 784


def _autoencoder_kernel(x_ref,
                        w1_ref, b1_ref, w2_ref, b2_ref, w3_ref, b3_ref,
                        w4_ref, b4_ref, w5_ref, b5_ref, w6_ref, b6_ref,
                        o_ref):
    """Process one [TB, 784] bf16 batch tile; all 6 layers fused, weights VMEM-resident."""

    def linear(h, w_ref, b_ref):
        # bf16 operands into the MXU, f32 accumulation, f32 bias add.
        return jnp.dot(h.astype(jnp.bfloat16), w_ref[...],
                       preferred_element_type=jnp.float32) + b_ref[...]

    h = x_ref[...]                                     # bf16 tile, fed straight to layer 1

    # encoder
    h = jnp.maximum(linear(h, w1_ref, b1_ref), 0.0)    # 784 -> 256
    h = jnp.maximum(linear(h, w2_ref, b2_ref), 0.0)    # 256 -> 64
    h = jnp.maximum(linear(h, w3_ref, b3_ref), 0.0)    # 64  -> 16
    # decoder
    h = jnp.maximum(linear(h, w4_ref, b4_ref), 0.0)    # 16  -> 64
    h = jnp.maximum(linear(h, w5_ref, b5_ref), 0.0)    # 64  -> 256
    h = linear(h, w6_ref, b6_ref)                      # 256 -> 784
    # sigmoid(x) == 0.5*tanh(x/2) + 0.5 : single EUP op, overflow-safe.
    h = 0.5 * jnp.tanh(0.5 * h) + 0.5

    o_ref[...] = h.astype(o_ref.dtype)


def _round_up(x, m):
    return ((x + m - 1) // m) * m


def _pick_tile(B, tb):
    """Batch tile: multiple of 8 (sublane), capped at tb, and split so grid >= 2
    whenever B allows it (keeps both v7x TensorCores busy)."""
    TB = min(tb, _round_up(B, 8))
    if B > 8 and pl.cdiv(B, TB) < 2:
        TB = _round_up(pl.cdiv(B, 2), 8)
    return TB


def _vmem_limit_bytes(TB, params):
    act_tile = TB * _FEATURES * 2                       # one bf16 activation tile
    weight_bytes = sum(int(p.size) * p.dtype.itemsize for p in params)
    inter = TB * 2224 * 4                               # f32 fused-chain intermediates (upper bound)
    est = 4 * act_tile + 2 * weight_bytes + inter + (4 << 20)
    # Clamp: >= v6e/v7x default scoped (32 MiB), <= v7x physical (64 MiB).
    return int(min(max(est, 32 << 20), 64 << 20))


def linear_autoencoder_forward(x, params, *, tb=1024):
    """x: [B, 784] (f32 or bf16).

    params: flat list [w1, b1, ..., w6, b6] with w: [in, out] bfloat16
    (kernel computes h @ W + b, matching PyTorch's x @ W.T + b) and b: [1, out] f32.

    Returns [B, 784] bfloat16 (sigmoid outputs; ~4e-3 max rounding error vs f32).
    """
    B, F = x.shape
    assert F == _FEATURES, f"expected {_FEATURES} features, got {F}"

    if x.dtype != jnp.bfloat16:
        x = x.astype(jnp.bfloat16)                      # halve streamed input bytes

    TB = _pick_tile(B, tb)
    grid_b = pl.cdiv(B, TB)                             # ragged last block; OOB writes masked

    io_spec = pl.BlockSpec((TB, _FEATURES), lambda i: (i, 0))
    # Constant index_map -> weights/biases stay resident in VMEM across grid steps.
    in_specs = [io_spec] + [pl.BlockSpec(p.shape, lambda i: (0, 0)) for p in params]

    return pl.pallas_call(
        _autoencoder_kernel,
        grid=(grid_b,),
        out_shape=jax.ShapeDtypeStruct((B, _FEATURES), jnp.bfloat16),
        in_specs=in_specs,
        out_specs=io_spec,
        compiler_params=pltpu.CompilerParams(
            dimension_semantics=("parallel",),          # megacore sharding on v7x
            vmem_limit_bytes=_vmem_limit_bytes(TB, params)),
    )(x, *params)


def init_params(key):
    """Deterministic init matching PyTorch nn.Linear default U[-1/sqrt(fan_in), +...].

    Weights stored [in, out] and cast to bf16 (MXU-native, half the HBM bytes);
    biases kept f32 with shape [1, out].
    """
    params = []
    for (fan_in, fan_out) in _LAYER_DIMS:
        key, kw, kb = jax.random.split(key, 3)
        bound = 1.0 / math.sqrt(fan_in)
        w = jax.random.uniform(kw, (fan_in, fan_out), jnp.float32, -bound, bound)
        b = jax.random.uniform(kb, (1, fan_out), jnp.float32, -bound, bound)
        params += [w.astype(jnp.bfloat16), b]
    return params


def reference_forward(x, params):
    """Plain-JAX reference mirroring the kernel's bf16-in / f32-accumulate matmuls."""
    h = x.astype(jnp.bfloat16)
    for i in range(6):
        w, b = params[2 * i], params[2 * i + 1]
        h = jnp.dot(h.astype(jnp.bfloat16), w,
                    preferred_element_type=jnp.float32) + b
        h = jnp.maximum(h, 0.0) if i < 5 else jax.nn.sigmoid(h)
    return h


if __name__ == "__main__":
    key = jax.random.PRNGKey(0)
    key, kx = jax.random.split(key)

    # Small test: B=20 exercises the TB-selection path (TB=16 -> 2 grid steps, so
    # both v7x cores would get work) and the ragged last block (rows 16..19 valid,
    # the rest masked on writeback).  Production batches just use the default tb.
    B = 20
    x = jax.random.uniform(kx, (B, 784), jnp.float32)   # flattened 28x28 "image"
    params = init_params(key)

    out = linear_autoencoder_forward(x, params)
    out = jax.block_until_ready(out)

    ref = reference_forward(x, params)
    assert out.shape == (B, 784)
    assert out.dtype == jnp.bfloat16
    # bf16 matmuls + bf16 output rounding of sigmoid values -> relaxed tolerance.
    assert jnp.allclose(out.astype(jnp.float32), ref, atol=2e-2, rtol=2e-2), \
        "mismatch vs reference"

    print("KERNEL_OK")
</pallas_src>

<mosaic_0001>
module attributes {stable_mosaic.version = 11 : i64} {
  func.func @_autoencoder_kernel(%arg0: i32, %arg1: memref<16x784xbf16, #tpu.memory_space<vmem>>, %arg2: memref<784x256xbf16, #tpu.memory_space<vmem>>, %arg3: memref<1x256xf32, #tpu.memory_space<vmem>>, %arg4: memref<256x64xbf16, #tpu.memory_space<vmem>>, %arg5: memref<1x64xf32, #tpu.memory_space<vmem>>, %arg6: memref<64x16xbf16, #tpu.memory_space<vmem>>, %arg7: memref<1x16xf32, #tpu.memory_space<vmem>>, %arg8: memref<16x64xbf16, #tpu.memory_space<vmem>>, %arg9: memref<1x64xf32, #tpu.memory_space<vmem>>, %arg10: memref<64x256xbf16, #tpu.memory_space<vmem>>, %arg11: memref<1x256xf32, #tpu.memory_space<vmem>>, %arg12: memref<256x784xbf16, #tpu.memory_space<vmem>>, %arg13: memref<1x784xf32, #tpu.memory_space<vmem>>, %arg14: memref<16x784xbf16, #tpu.memory_space<vmem>>) attributes {dimension_semantics = [#tpu.dimension_semantics<parallel>], iteration_bounds = array<i64: 2>, scalar_prefetch = 0 : i64, scratch_operands = 0 : i64, tpu.core_type = #tpu.core_type<tc>, window_params = [{transform_indices = @transform_0, window_bounds = array<i64: 16, 784>}, {pipeline_mode = #tpu.pipeline_mode<synchronous>, transform_indices = @transform_1, window_bounds = array<i64: 784, 256>}, {pipeline_mode = #tpu.pipeline_mode<synchronous>, transform_indices = @transform_2, window_bounds = array<i64: 1, 256>}, {pipeline_mode = #tpu.pipeline_mode<synchronous>, transform_indices = @transform_3, window_bounds = array<i64: 256, 64>}, {pipeline_mode = #tpu.pipeline_mode<synchronous>, transform_indices = @transform_4, window_bounds = array<i64: 1, 64>}, {pipeline_mode = #tpu.pipeline_mode<synchronous>, transform_indices = @transform_5, window_bounds = array<i64: 64, 16>}, {pipeline_mode = #tpu.pipeline_mode<synchronous>, transform_indices = @transform_6, window_bounds = array<i64: 1, 16>}, {pipeline_mode = #tpu.pipeline_mode<synchronous>, transform_indices = @transform_7, window_bounds = array<i64: 16, 64>}, {pipeline_mode = #tpu.pipeline_mode<synchronous>, transform_indices = @transform_8, window_bounds = array<i64: 1, 64>}, {pipeline_mode = #tpu.pipeline_mode<synchronous>, transform_indices = @transform_9, window_bounds = array<i64: 64, 256>}, {pipeline_mode = #tpu.pipeline_mode<synchronous>, transform_indices = @transform_10, window_bounds = array<i64: 1, 256>}, {pipeline_mode = #tpu.pipeline_mode<synchronous>, transform_indices = @transform_11, window_bounds = array<i64: 256, 784>}, {pipeline_mode = #tpu.pipeline_mode<synchronous>, transform_indices = @transform_12, window_bounds = array<i64: 1, 784>}, {transform_indices = @transform_13, window_bounds = array<i64: 16, 784>}]} {
    %c0 = arith.constant 0 : index
    %c0_0 = arith.constant 0 : index
    %0 = vector.load %arg1[%c0, %c0_0] : memref<16x784xbf16, #tpu.memory_space<vmem>>, vector<16x784xbf16>
    %c0_1 = arith.constant 0 : index
    %c0_2 = arith.constant 0 : index
    %1 = vector.load %arg2[%c0_1, %c0_2] : memref<784x256xbf16, #tpu.memory_space<vmem>>, vector<784x256xbf16>
    %cst = arith.constant dense<0.000000e+00> : vector<16x256xf32>
    %2 = tpu.matmul %0, %1, %cst {dimension_numbers = #tpu.dot_dimension_numbers<[1], [0], [0], [1], [0, 0, 1, 1], [], []>} : vector<16x784xbf16>, vector<784x256xbf16>, vector<16x256xf32> -> vector<16x256xf32>
    %c0_3 = arith.constant 0 : index
    %c0_4 = arith.constant 0 : index
    %3 = vector.load %arg3[%c0_3, %c0_4] : memref<1x256xf32, #tpu.memory_space<vmem>>, vector<1x256xf32>
    %4 = vector.broadcast %3 : vector<1x256xf32> to vector<16x256xf32>
    %5 = arith.addf %2, %4 : vector<16x256xf32>
    %cst_5 = arith.constant 0.000000e+00 : f32
    %6 = vector.broadcast %cst_5 : f32 to vector<16x256xf32>
    %7 = arith.maximumf %5, %6 : vector<16x256xf32>
    %8 = arith.truncf %7 : vector<16x256xf32> to vector<16x256xbf16>
    %c0_6 = arith.constant 0 : index
    %c0_7 = arith.constant 0 : index
    %9 = vector.load %arg4[%c0_6, %c0_7] : memref<256x64xbf16, #tpu.memory_space<vmem>>, vector<256x64xbf16>
    %cst_8 = arith.constant dense<0.000000e+00> : vector<16x64xf32>
    %10 = tpu.matmul %8, %9, %cst_8 {dimension_numbers = #tpu.dot_dimension_numbers<[1], [0], [0], [1], [0, 0, 1, 1], [], []>} : vector<16x256xbf16>, vector<256x64xbf16>, vector<16x64xf32> -> vector<16x64xf32>
    %c0_9 = arith.constant 0 : index
    %c0_10 = arith.constant 0 : index
    %11 = vector.load %arg5[%c0_9, %c0_10] : memref<1x64xf32, #tpu.memory_space<vmem>>, vector<1x64xf32>
    %12 = vector.broadcast %11 : vector<1x64xf32> to vector<16x64xf32>
    %13 = arith.addf %10, %12 : vector<16x64xf32>
    %cst_11 = arith.constant 0.000000e+00 : f32
    %14 = vector.broadcast %cst_11 : f32 to vector<16x64xf32>
    %15 = arith.maximumf %13, %14 : vector<16x64xf32>
    %16 = arith.truncf %15 : vector<16x64xf32> to vector<16x64xbf16>
    %c0_12 = arith.constant 0 : index
    %c0_13 = arith.constant 0 : index
    %17 = vector.load %arg6[%c0_12, %c0_13] : memref<64x16xbf16, #tpu.memory_space<vmem>>, vector<64x16xbf16>
    %cst_14 = arith.constant dense<0.000000e+00> : vector<16x16xf32>
    %18 = tpu.matmul %16, %17, %cst_14 {dimension_numbers = #tpu.dot_dimension_numbers<[1], [0], [0], [1], [0, 0, 1, 1], [], []>} : vector<16x64xbf16>, vector<64x16xbf16>, vector<16x16xf32> -> vector<16x16xf32>
    %c0_15 = arith.constant 0 : index
    %c0_16 = arith.constant 0 : index
    %19 = vector.load %arg7[%c0_15, %c0_16] : memref<1x16xf32, #tpu.memory_space<vmem>>, vector<1x16xf32>
    %20 = vector.broadcast %19 : vector<1x16xf32> to vector<16x16xf32>
    %21 = arith.addf %18, %20 : vector<16x16xf32>
    %cst_17 = arith.constant 0.000000e+00 : f32
    %22 = vector.broadcast %cst_17 : f32 to vector<16x16xf32>
    %23 = arith.maximumf %21, %22 : vector<16x16xf32>
    %24 = arith.truncf %23 : vector<16x16xf32> to vector<16x16xbf16>
    %c0_18 = arith.constant 0 : index
    %c0_19 = arith.constant 0 : index
    %25 = vector.load %arg8[%c0_18, %c0_19] : memref<16x64xbf16, #tpu.memory_space<vmem>>, vector<16x64xbf16>
    %cst_20 = arith.constant dense<0.000000e+00> : vector<16x64xf32>
    %26 = tpu.matmul %24, %25, %cst_20 {dimension_numbers = #tpu.dot_dimension_numbers<[1], [0], [0], [1], [0, 0, 1, 1], [], []>} : vector<16x16xbf16>, vector<16x64xbf16>, vector<16x64xf32> -> vector<16x64xf32>
    %c0_21 = arith.constant 0 : index
    %c0_22 = arith.constant 0 : index
    %27 = vector.load %arg9[%c0_21, %c0_22] : memref<1x64xf32, #tpu.memory_space<vmem>>, vector<1x64xf32>
    %28 = vector.broadcast %27 : vector<1x64xf32> to vector<16x64xf32>
    %29 = arith.addf %26, %28 : vector<16x64xf32>
    %cst_23 = arith.constant 0.000000e+00 : f32
    %30 = vector.broadcast %cst_23 : f32 to vector<16x64xf32>
    %31 = arith.maximumf %29, %30 : vector<16x64xf32>
    %32 = arith.truncf %31 : vector<16x64xf32> to vector<16x64xbf16>
    %c0_24 = arith.constant 0 : index
    %c0_25 = arith.constant 0 : index
    %33 = vector.load %arg10[%c0_24, %c0_25] : memref<64x256xbf16, #tpu.memory_space<vmem>>, vector<64x256xbf16>
    %cst_26 = arith.constant dense<0.000000e+00> : vector<16x256xf32>
    %34 = tpu.matmul %32, %33, %cst_26 {dimension_numbers = #tpu.dot_dimension_numbers<[1], [0], [0], [1], [0, 0, 1, 1], [], []>} : vector<16x64xbf16>, vector<64x256xbf16>, vector<16x256xf32> -> vector<16x256xf32>
    %c0_27 = arith.constant 0 : index
    %c0_28 = arith.constant 0 : index
    %35 = vector.load %arg11[%c0_27, %c0_28] : memref<1x256xf32, #tpu.memory_space<vmem>>, vector<1x256xf32>
    %36 = vector.broadcast %35 : vector<1x256xf32> to vector<16x256xf32>
    %37 = arith.addf %34, %36 : vector<16x256xf32>
    %cst_29 = arith.constant 0.000000e+00 : f32
    %38 = vector.broadcast %cst_29 : f32 to vector<16x256xf32>
    %39 = arith.maximumf %37, %38 : vector<16x256xf32>
    %40 = arith.truncf %39 : vector<16x256xf32> to vector<16x256xbf16>
    %c0_30 = arith.constant 0 : index
    %c0_31 = arith.constant 0 : index
    %41 = vector.load %arg12[%c0_30, %c0_31] : memref<256x784xbf16, #tpu.memory_space<vmem>>, vector<256x784xbf16>
    %cst_32 = arith.constant dense<0.000000e+00> : vector<16x784xf32>
    %42 = tpu.matmul %40, %41, %cst_32 {dimension_numbers = #tpu.dot_dimension_numbers<[1], [0], [0], [1], [0, 0, 1, 1], [], []>} : vector<16x256xbf16>, vector<256x784xbf16>, vector<16x784xf32> -> vector<16x784xf32>
    %c0_33 = arith.constant 0 : index
    %c0_34 = arith.constant 0 : index
    %43 = vector.load %arg13[%c0_33, %c0_34] : memref<1x784xf32, #tpu.memory_space<vmem>>, vector<1x784xf32>
    %44 = vector.broadcast %43 : vector<1x784xf32> to vector<16x784xf32>
    %45 = arith.addf %42, %44 : vector<16x784xf32>
    %cst_35 = arith.constant 5.000000e-01 : f32
    %46 = vector.broadcast %cst_35 : f32 to vector<16x784xf32>
    %47 = arith.mulf %46, %45 : vector<16x784xf32>
    %48 = math.tanh %47 : vector<16x784xf32>
    %cst_36 = arith.constant 5.000000e-01 : f32
    %49 = vector.broadcast %cst_36 : f32 to vector<16x784xf32>
    %50 = arith.mulf %49, %48 : vector<16x784xf32>
    %cst_37 = arith.constant 5.000000e-01 : f32
    %51 = vector.broadcast %cst_37 : f32 to vector<16x784xf32>
    %52 = arith.addf %50, %51 : vector<16x784xf32>
    %53 = arith.truncf %52 : vector<16x784xf32> to vector<16x784xbf16>
    %c0_38 = arith.constant 0 : index
    %c0_39 = arith.constant 0 : index
    %54 = vector.load %arg14[%c0_38, %c0_39] : memref<16x784xbf16, #tpu.memory_space<vmem>>, vector<16x784xbf16>
    tpu.vector_store %arg14[%c0_38, %c0_39], %53 {strides = array<i32>} : memref<16x784xbf16, #tpu.memory_space<vmem>>, vector<16x784xbf16>,
    return
  }
  func.func @transform_0(%arg0: i32) -> (i32, i32) {
    %c0_i32 = arith.constant 0 : i32
    %c0_i32_0 = arith.constant 0 : i32
    return %arg0, %c0_i32 : i32, i32
  }
  func.func @transform_1(%arg0: i32) -> (i32, i32) {
    %c0_i32 = arith.constant 0 : i32
    %c0_i32_0 = arith.constant 0 : i32
    %c0_i32_1 = arith.constant 0 : i32
    return %c0_i32, %c0_i32_0 : i32, i32
  }
  func.func @transform_2(%arg0: i32) -> (i32, i32) {
    %c0_i32 = arith.constant 0 : i32
    %c0_i32_0 = arith.constant 0 : i32
    %c0_i32_1 = arith.constant 0 : i32
    return %c0_i32, %c0_i32_0 : i32, i32
  }
  func.func @transform_3(%arg0: i32) -> (i32, i32) {
    %c0_i32 = arith.constant 0 : i32
    %c0_i32_0 = arith.constant 0 : i32
    %c0_i32_1 = arith.constant 0 : i32
    return %c0_i32, %c0_i32_0 : i32, i32
  }
  func.func @transform_4(%arg0: i32) -> (i32, i32) {
    %c0_i32 = arith.constant 0 : i32
    %c0_i32_0 = arith.constant 0 : i32
    %c0_i32_1 = arith.constant 0 : i32
    return %c0_i32, %c0_i32_0 : i32, i32
  }
  func.func @transform_5(%arg0: i32) -> (i32, i32) {
    %c0_i32 = arith.constant 0 : i32
    %c0_i32_0 = arith.constant 0 : i32
    %c0_i32_1 = arith.constant 0 : i32
    return %c0_i32, %c0_i32_0 : i32, i32
  }
  func.func @transform_6(%arg0: i32) -> (i32, i32) {
    %c0_i32 = arith.constant 0 : i32
    %c0_i32_0 = arith.constant 0 : i32
    %c0_i32_1 = arith.constant 0 : i32
    return %c0_i32, %c0_i32_0 : i32, i32
  }
  func.func @transform_7(%arg0: i32) -> (i32, i32) {
    %c0_i32 = arith.constant 0 : i32
    %c0_i32_0 = arith.constant 0 : i32
    %c0_i32_1 = arith.constant 0 : i32
    return %c0_i32, %c0_i32_0 : i32, i32
  }
  func.func @transform_8(%arg0: i32) -> (i32, i32) {
    %c0_i32 = arith.constant 0 : i32
    %c0_i32_0 = arith.constant 0 : i32
    %c0_i32_1 = arith.constant 0 : i32
    return %c0_i32, %c0_i32_0 : i32, i32
  }
  func.func @transform_9(%arg0: i32) -> (i32, i32) {
    %c0_i32 = arith.constant 0 : i32
    %c0_i32_0 = arith.constant 0 : i32
    %c0_i32_1 = arith.constant 0 : i32
    return %c0_i32, %c0_i32_0 : i32, i32
  }
  func.func @transform_10(%arg0: i32) -> (i32, i32) {
    %c0_i32 = arith.constant 0 : i32
    %c0_i32_0 = arith.constant 0 : i32
    %c0_i32_1 = arith.constant 0 : i32
    return %c0_i32, %c0_i32_0 : i32, i32
  }
  func.func @transform_11(%arg0: i32) -> (i32, i32) {
    %c0_i32 = arith.constant 0 : i32
    %c0_i32_0 = arith.constant 0 : i32
    %c0_i32_1 = arith.constant 0 : i32
    return %c0_i32, %c0_i32_0 : i32, i32
  }
  func.func @transform_12(%arg0: i32) -> (i32, i32) {
    %c0_i32 = arith.constant 0 : i32
    %c0_i32_0 = arith.constant 0 : i32
    %c0_i32_1 = arith.constant 0 : i32
    return %c0_i32, %c0_i32_0 : i32, i32
  }
  func.func @transform_13(%arg0: i32) -> (i32, i32) {
    %c0_i32 = arith.constant 0 : i32
    %c0_i32_0 = arith.constant 0 : i32
    return %arg0, %c0_i32 : i32, i32
  }
}

</mosaic_0001>

<bundles_post_ra>
// kernel: tpu_custom_call.1
= control target key start
LH: loop header
LB: loop body
LE: loop exit
PB: predicated region body
PF: predicated region fallthrough
CT: control target
= control target key end

     0   :  { %s5806_s0 = inlined_call_operand.vmem [shape: bf16[20,784], index: 0, kind: input, shape index: {}]   ;;  %s5807_s1 = inlined_call_operand.vmem [shape: bf16[784,256], index: 1, kind: input, shape index: {}]   ;;  %s5808_s2 = inlined_call_operand.vmem [shape: f32[1,256], index: 2, kind: input, shape index: {}]   ;;  %s5809_s3 = inlined_call_operand.vmem [shape: bf16[256,64], index: 3, kind: input, shape index: {}]   ;;  %s5810_s4 = inlined_call_operand.vmem [shape: f32[1,64], index: 4, kind: input, shape index: {}]   ;;  %s5811_s5 = inlined_call_operand.vmem [shape: bf16[64,16], index: 5, kind: input, shape index: {}]   ;;  %s5812_s6 = inlined_call_operand.vmem [shape: f32[1,16], index: 6, kind: input, shape index: {}]   ;;  %s5813_s7 = inlined_call_operand.vmem [shape: bf16[16,64], index: 7, kind: input, shape index: {}]   ;;  %s5814_s8 = inlined_call_operand.vmem [shape: f32[1,64], index: 8, kind: input, shape index: {}]   ;;  %s5815_s9 = inlined_call_operand.vmem [shape: bf16[64,256], index: 9, kind: input, shape index: {}]   ;;  %s5816_s10 = inlined_call_operand.vmem [shape: f32[1,256], index: 10, kind: input, shape index: {}]   ;;  %s5817_s11 = inlined_call_operand.vmem [shape: bf16[256,784], index: 11, kind: input, shape index: {}]   ;;  %s5818_s12 = inlined_call_operand.vmem [shape: f32[1,784], index: 12, kind: input, shape index: {}]   ;;  %s5819_s13 = inlined_call_operand.hbm [shape: bf16[20,784], index: 13, kind: output, shape index: {}]  }
   0x1   :  { %5825 = sst [smem:[#allocation10_spill]] %s5806_s0 }
   0x2   :  { %18 = vsyncpa [#allocation3], 0 }
   0x3   :  { %20 = vsyncpa [#allocation3 + $0x1], 0  ;;  %s4211_s25 = smov 0   ;;  %s4213_s26 = smov 0  }
   0x4   :  { %s4215_s27 = smov 0   ;;  %s4217_s28 = smov 0  }
   0x5 LB: > { %5826 = sst [smem:[#allocation5_spill]] %s4124_s25  ;;  %s4232_s29 = sadd.s32 4294967295, %s4136_s28   ;;  %s4136_s28 = sphi %s4217_s28, %s5839_s28   ;;  %s4132_s27 = sphi %s4215_s27, %s5841_s27   ;;  %s4128_s26 = sphi %s4213_s26, %s5843_s26   ;;  %s4124_s25 = sphi %s4211_s25, %s5842_s25  }
   0x6   : > { %5827 = sst [smem:[#allocation6_spill]] %s4132_s27  ;;  %s2738_s30 = sadd.s32 4294967294, %s4136_s28  }
   0x7   : > { %s4236_s14 = sadd.s32 1, %s4136_s28   ;;  %s311_s15 = sadd.s32 1, %s4132_s27 }
   0x8   : > { %5828 = sst [smem:[#allocation7_spill]] %s4236_s14  ;;  %s308_s16 = ssub.s32 %s4136_s28, %s4236_s14 }
   0x9   : > { %p321_p0 = scmp.ne.s32.totalorder %s4132_s27, %s4128_s26  ;;  %p309_p1 = scmp.eq.s32.totalorder %s308_s16, 0 }
   0xa   : > { %p322_p2 = scmp.eq.s32.totalorder %s4232_s29, 1  ;;  %p327_p3 = scmp.ne.s32.totalorder %s4128_s26, %s4124_s25 }
   0xb   : > { %p328_p4 = scmp.eq.s32.totalorder %s2738_s30, 1  ;;  %p2741_p7 = scmp.ge.s32.totalorder %s4136_s28, 1 }
   0xc   : > { %s4247_s17 = scalar_select %p309_p1, %s4132_s27, %s311_s15  }
   0xd   : > { %p4249_p5 = por %p322_p2, %p321_p0  ;;  %p4253_p6 = por %p328_p4, %p327_p3 }
   0xe   : > { %5829 = sst [smem:[#allocation8_spill]] %s4247_s17  ;;  %p402_p8 = scmp.lt.s32.totalorder %s4136_s28, 3 }
   0xf   : > { %s5831_s19 = scalar_select %p4253_p6, 1, 0 }
  0x10   : > { %p403_p9 = pnand %p2741_p7, %p402_p8 }
  0x11   : > { %5832 = sst [smem:[#allocation9_spill]] %s5831_s19  ;;  %s4434_s15 = sshll.u32 (!%p403_p9), %s4232_s29, 1 }
  0x12   : > { %406 = sbr.rel (%p403_p9) target bundleno = 1110 (0x456), region = 72  ;;  %p458_p10 = scmp.lt.s32.totalorder (!%p403_p9), %s4434_s15, 2 }
  0x13   : > { %s5833_s0 = sld [smem:[#allocation10_spill]] (!%p403_p9)  ;;  %s5834_s14 = sand.u32 (!%p403_p9), 1, %s4128_s26  }
  0x14   : > { %s3989_s25 = smul.u32 (!%p403_p9), 56, %s5834_s14  ;;  %s5835_s16 = smov (!%p403_p9), %s5834_s14 }
  0x15   : > { %s5748_s22 = scalar_lea.sflag (!%p403_p9), [#allocation3], %s5835_s16 }
  0x16   : > { %s5733_s17 = scalar_lea.vmem (!%p403_p9), [#allocation2], %s3989_s25 }
  0x17   : > { %v2830_v0 = vld [vmem:[%s5807_s1 + $0x70] sm:$0xf]  ;;  %v3765_v1 = vld [vmem:[%s5807_s1 + $0x74] sm:$0xf0]  ;;  %v2822_v11 = vld [vmem:[%s5807_s1 + $0x60] sm:$0xf] }
  0x18   : > { %v2958_v2 = vld [vmem:[%s5807_s1 + $0x170] sm:$0xf]  ;;  %v2831_v3 = vor.u32 %v3765_v1, %v2830_v0  ;;  %v3797_v4 = vld [vmem:[%s5807_s1 + $0x174] sm:$0xf0]  ;;  %v3763_v13 = vld [vmem:[%s5807_s1 + $0x64] sm:$0xf0] }
  0x19   : > { %v3022_v5 = vld [vmem:[%s5807_s1 + $0x1f0] sm:$0xf]  ;;  %v3813_v6 = vld [vmem:[%s5807_s1 + $0x1f4] sm:$0xf0]  ;;  %v2959_v7 = vor.u32 %v3797_v4, %v2958_v2  ;;  %v2950_v14 = vld [vmem:[%s5807_s1 + $0x160] sm:$0xf]  ;;  %v2823_v16 = vor.u32 %v3763_v13, %v2822_v11 }
  0x1a   : > { %v3023_v8 = vor.u32 %v3813_v6, %v3022_v5  ;;  %v2894_v9 = vld [vmem:[%s5807_s1 + $0xf0] sm:$0xf]  ;;  %v3781_v10 = vld [vmem:[%s5807_s1 + $0xf4] sm:$0xf0]  ;;  %1117 = vmatpush.bf16.msra.mxu0 %v2831_v3  ;;  %v3795_v15 = vld [vmem:[%s5807_s1 + $0x164] sm:$0xf0] }
  0x1b   : > { %v2895_v12 = vor.u32 %v3781_v10, %v2894_v9  ;;  %1145 = vmatpush.bf16.msra.mxu2 %v2959_v7  ;;  %v2951_v17 = vor.u32 %v3795_v15, %v2950_v14  ;;  %v3014_v18 = vld [vmem:[%s5807_s1 + $0x1e0] sm:$0xf]  ;;  %v3811_v19 = vld [vmem:[%s5807_s1 + $0x1e4] sm:$0xf0]  ;;  %v2814_v23 = vld [vmem:[%s5807_s1 + $0x50] sm:$0xf] }
  0x1c   : > { %1159 = vmatpush.bf16.msra.mxu3 %v3023_v8  ;;  %v2886_v20 = vld [vmem:[%s5807_s1 + $0xe0] sm:$0xf]  ;;  %v3015_v21 = vor.u32 %v3811_v19, %v3014_v18  ;;  %v3779_v22 = vld [vmem:[%s5807_s1 + $0xe4] sm:$0xf0]  ;;  %v3761_v24 = vld [vmem:[%s5807_s1 + $0x54] sm:$0xf0] }
  0x1d   : > { %1131 = vmatpush.bf16.msra.mxu1 %v2895_v12  ;;  %v2887_v25 = vor.u32 %v3779_v22, %v2886_v20  ;;  %v2942_v26 = vld [vmem:[%s5807_s1 + $0x150] sm:$0xf]  ;;  %v3793_v27 = vld [vmem:[%s5807_s1 + $0x154] sm:$0xf0]  ;;  %v2815_v29 = vor.u32 %v3761_v24, %v2814_v23  ;;  %v2806_v35 = vld [vmem:[%s5807_s1 + $0x40] sm:$0xf] }
  0x1e   : > { %v3006_v28 = vld [vmem:[%s5807_s1 + $0x1d0] sm:$0xf]  ;;  %1118 = vmatpush.bf16.msra.mxu0 %v2823_v16  ;;  %v3809_v30 = vld [vmem:[%s5807_s1 + $0x1d4] sm:$0xf0]  ;;  %v2943_v33 = vor.u32 %v3793_v27, %v2942_v26  ;;  %v3759_v36 = vld [vmem:[%s5807_s1 + $0x44] sm:$0xf0] }
  0x1f   : > { %v2878_v31 = vld [vmem:[%s5807_s1 + $0xd0] sm:$0xf]  ;;  %v3777_v32 = vld [vmem:[%s5807_s1 + $0xd4] sm:$0xf0]  ;;  %1146 = vmatpush.bf16.msra.mxu2 %v2951_v17  ;;  %v3007_v34 = vor.u32 %v3809_v30, %v3006_v28  ;;  %v2934_v37 = vld [vmem:[%s5807_s1 + $0x140] sm:$0xf]  ;;  %v2807_v44 = vor.u32 %v3759_v36, %v2806_v35 }
  0x20   : > { %1160 = vmatpush.bf16.msra.mxu3 %v3015_v21  ;;  %v2879_v38 = vor.u32 %v3777_v32, %v2878_v31  ;;  %v3791_v39 = vld [vmem:[%s5807_s1 + $0x144] sm:$0xf0]  ;;  %v2998_v40 = vld [vmem:[%s5807_s1 + $0x1c0] sm:$0xf]  ;;  %v2798_v47 = vld [vmem:[%s5807_s1 + $0x30] sm:$0xf] }
  0x21   : > { %1132 = vmatpush.bf16.msra.mxu1 %v2887_v25  ;;  %v3807_v41 = vld [vmem:[%s5807_s1 + $0x1c4] sm:$0xf0]  ;;  %v2870_v42 = vld [vmem:[%s5807_s1 + $0xc0] sm:$0xf]  ;;  %v2935_v45 = vor.u32 %v3791_v39, %v2934_v37  ;;  %v3757_v48 = vld [vmem:[%s5807_s1 + $0x34] sm:$0xf0] }
  0x22   : > { %v3775_v43 = vld [vmem:[%s5807_s1 + $0xc4] sm:$0xf0]  ;;  %1119 = vmatpush.bf16.msra.mxu0 %v2815_v29  ;;  %v2999_v46 = vor.u32 %v3807_v41, %v2998_v40  ;;  %v2926_v49 = vld [vmem:[%s5807_s1 + $0x130] sm:$0xf]  ;;  %v3789_v51 = vld [vmem:[%s5807_s1 + $0x134] sm:$0xf0]  ;;  %v2799_v56 = vor.u32 %v3757_v48, %v2798_v47 }
  0x23   : > { %1147 = vmatpush.bf16.msra.mxu2 %v2943_v33  ;;  %v2871_v50 = vor.u32 %v3775_v43, %v2870_v42  ;;  %v2990_v52 = vld [vmem:[%s5807_s1 + $0x1b0] sm:$0xf]  ;;  %v3805_v53 = vld [vmem:[%s5807_s1 + $0x1b4] sm:$0xf0]  ;;  %v2927_v57 = vor.u32 %v3789_v51, %v2926_v49  ;;  %v2790_v59 = vld [vmem:[%s5807_s1 + $0x20] sm:$0xf] }
  0x24   : > { %1161 = vmatpush.bf16.msra.mxu3 %v3007_v34  ;;  %v2862_v54 = vld [vmem:[%s5807_s1 + $0xb0] sm:$0xf]  ;;  %v3773_v55 = vld [vmem:[%s5807_s1 + $0xb4] sm:$0xf0]  ;;  %v2991_v58 = vor.u32 %v3805_v53, %v2990_v52  ;;  %v3755_v60 = vld [vmem:[%s5807_s1 + $0x24] sm:$0xf0] }
  0x25   : > { %1133 = vmatpush.bf16.msra.mxu1 %v2879_v38  ;;  %v2918_v61 = vld [vmem:[%s5807_s1 + $0x120] sm:$0xf]  ;;  %v2863_v62 = vor.u32 %v3773_v55, %v2862_v54  ;;  %v3787_v63 = vld [vmem:[%s5807_s1 + $0x124] sm:$0xf0]  ;;  %v2791_v4 = vor.u32 %v3755_v60, %v2790_v59  ;;  %v2782_v5 = vld [vmem:[%s5807_s1 + $0x10] sm:$0xf] }
  0x26   : > { %1120 = vmatpush.bf16.msra.mxu0 %v2807_v44  ;;  %v2982_v0 = vld [vmem:[%s5807_s1 + $0x1a0] sm:$0xf]  ;;  %v3803_v1 = vld [vmem:[%s5807_s1 + $0x1a4] sm:$0xf0]  ;;  %v3753_v6 = vld [vmem:[%s5807_s1 + $0x14] sm:$0xf0]  ;;  %v2919_v7 = vor.u32 %v3787_v63, %v2918_v61 }
  0x27   : > { %1148 = vmatpush.bf16.msra.mxu2 %v2935_v45  ;;  %v2854_v2 = vld [vmem:[%s5807_s1 + $0xa0] sm:$0xf]  ;;  %v3771_v3 = vld [vmem:[%s5807_s1 + $0xa4] sm:$0xf0]  ;;  %v2983_v8 = vor.u32 %v3803_v1, %v2982_v0  ;;  %v2910_v9 = vld [vmem:[%s5807_s1 + $0x110] sm:$0xf]  ;;  %v2783_v18 = vor.u32 %v3753_v6, %v2782_v5 }
  0x28   : > { %1162 = vmatpush.bf16.msra.mxu3 %v2999_v46  ;;  %v3785_v10 = vld [vmem:[%s5807_s1 + $0x114] sm:$0xf0]  ;;  %v2974_v11 = vld [vmem:[%s5807_s1 + $0x190] sm:$0xf]  ;;  %v2855_v12 = vor.u32 %v3771_v3, %v2854_v2  ;;  %v2774_v16 = vld [vmem:[%s5807_s1] sm:$0xf] }
  0x29   : > { %1134 = vmatpush.bf16.msra.mxu1 %v2871_v50  ;;  %v3801_v13 = vld [vmem:[%s5807_s1 + $0x194] sm:$0xf0]  ;;  %v2846_v14 = vld [vmem:[%s5807_s1 + $0x90] sm:$0xf]  ;;  %v3751_v17 = vld [vmem:[%s5807_s1 + $0x4] sm:$0xf0]  ;;  %v2911_v23 = vor.u32 %v3785_v10, %v2910_v9 }
  0x2a   : > { %1121 = vmatpush.bf16.msra.mxu0 %v2799_v56  ;;  %v3769_v15 = vld [vmem:[%s5807_s1 + $0x94] sm:$0xf0]  ;;  %v2902_v19 = vld [vmem:[%s5807_s1 + $0x100] sm:$0xf]  ;;  %v3783_v20 = vld [vmem:[%s5807_s1 + $0x104] sm:$0xf0]  ;;  %v2975_v24 = vor.u32 %v3801_v13, %v2974_v11  ;;  %v2775_v34 = vor.u32 %v3751_v17, %v2774_v16 }
  0x2b   : > { %1149 = vmatpush.bf16.msra.mxu2 %v2927_v57  ;;  %v2966_v21 = vld [vmem:[%s5807_s1 + $0x180] sm:$0xf]  ;;  %v3799_v22 = vld [vmem:[%s5807_s1 + $0x184] sm:$0xf0]  ;;  %v3086_v25 = vld [vmem:[%s5807_s1 + $0x270] sm:$0xf]  ;;  %v2847_v28 = vor.u32 %v3769_v15, %v2846_v14  ;;  %v2903_v37 = vor.u32 %v3783_v20, %v2902_v19 }
  0x2c   : > { %1163 = vmatpush.bf16.msra.mxu3 %v2991_v58  ;;  %v3829_v26 = vld [vmem:[%s5807_s1 + $0x274] sm:$0xf0]  ;;  %v3764_v27 = vld [vmem:[%s5807_s1 + $0x74] sm:$0xf]  ;;  %v2832_v29 = vld [vmem:[%s5807_s1 + $0x78] sm:$0xf0]  ;;  %v2967_v38 = vor.u32 %v3799_v22, %v2966_v21 }
  0x2d   : > { %1135 = vmatpush.bf16.msra.mxu1 %v2863_v62  ;;  %v2838_v30 = vld [vmem:[%s5807_s1 + $0x80] sm:$0xf]  ;;  %s459_s24 = scalar_select %p458_p10, %s4434_s15, 2  ;;  %v3767_v31 = vld [vmem:[%s5807_s1 + $0x84] sm:$0xf0]  ;;  %v3087_v42 = vor.u32 %v3829_v26, %v3086_v25  ;;  %v2835_v43 = vor.u32 %v3764_v27, %v2832_v29  ;;  %vm1113_vm0 = vcmask 130048  }
  0x2e   : > { %1122 = vmatpush.bf16.msra.mxu0 %v2791_v4  ;;  %v3150_v32 = vld [vmem:[%s5807_s1 + $0x2f0] sm:$0xf]  ;;  %v3845_v33 = vld [vmem:[%s5807_s1 + $0x2f4] sm:$0xf0]  ;;  %v3158_v35 = vld [vmem:[%s5807_s1 + $0x300] sm:$0xf]  ;;  %v2839_v47 = vor.u32 %v3767_v31, %v2838_v30 }
  0x2f   : > { %1150 = vmatpush.bf16.msra.mxu2 %v2919_v7  ;;  %s3990_s20 = smul.u32 28, %s459_s24  ;;  %v3847_v36 = vld [vmem:[%s5807_s1 + $0x304] sm:$0xf0]  ;;  %v3780_v39 = vld [vmem:[%s5807_s1 + $0xf4] sm:$0xf]  ;;  %v3151_v54 = vor.u32 %v3845_v33, %v3150_v32  ;;  %vm1518_vm1 = vcmask 523264  }
  0x30   : > { %1164 = vmatpush.bf16.msra.mxu3 %v2983_v8  ;;  %v2896_v40 = vld [vmem:[%s5807_s1 + $0xf8] sm:$0xf0]  ;;  %v3078_v41 = vld [vmem:[%s5807_s1 + $0x260] sm:$0xf]  ;;  %v3827_v44 = vld [vmem:[%s5807_s1 + $0x264] sm:$0xf0]  ;;  %v3159_v50 = vor.u32 %v3847_v36, %v3158_v35 }
  0x31   : > { %1136 = vmatpush.bf16.msra.mxu1 %v2855_v12  ;;  %s4492_s21 = scalar_lea.vmem %s5833_s0, %s3990_s20  ;;  %v3762_v45 = vld [vmem:[%s5807_s1 + $0x64] sm:$0xf]  ;;  %v2824_v46 = vld [vmem:[%s5807_s1 + $0x68] sm:$0xf0]  ;;  %v3142_v52 = vld [vmem:[%s5807_s1 + $0x2e0] sm:$0xf]  ;;  %v2899_v58 = vor.u32 %v3780_v39, %v2896_v40  ;;  %v3079_v0 = vor.u32 %v3827_v44, %v3078_v41 }
  0x32   : > { %1123 = vmatpush.bf16.msra.mxu0 %v2783_v18  ;;  %v2754_v48 = vld [vmem:[%s4492_s21 + $0x8] sm:$0xf]  ;;  %v3747_v49 = vld [vmem:[%s4492_s21 + $0x20] sm:$0xf0]  ;;  %v2746_v51 = vld [vmem:[%s4492_s21] sm:$0xf]  ;;  %v2827_v3 = vor.u32 %v3762_v45, %v2824_v46 }
  0x33   : > { %1151 = vmatpush.bf16.msra.mxu2 %v2911_v23  ;;  %v4509_v53 = vor.u32 %v3747_v49, %v2754_v48  ;;  %v3746_v55 = vld [vmem:[%s4492_s21 + $0x18] sm:$0xf0]  ;;  %v3744_v56 = vld [vmem:[%s4492_s21 + $0xc] sm:$0xf]  ;;  %v2756_v57 = vld [vmem:[%s4492_s21 + $0x24] sm:$0xf0] }
  0x34   : > { %1165 = vmatpush.bf16.msra.mxu3 %v2975_v24  ;;  %v4514_v59 = vor.u32 %v3746_v55, %v2746_v51  ;;  %v3743_v60 = vld [vmem:[%s4492_s21 + $0x4] sm:$0xf]  ;;  %v2748_v61 = vld [vmem:[%s4492_s21 + $0x1c] sm:$0xf0]  ;;  %v3843_v62 = vld [vmem:[%s5807_s1 + $0x2e4] sm:$0xf0]  ;;  %v4521_v63 = vor.u32 %v3744_v56, %v2756_v57 }
  0x35   : > { %1137 = vmatpush.bf16.msra.mxu1 %v2847_v28  ;;  %v3778_v1 = vld [vmem:[%s5807_s1 + $0xe4] sm:$0xf]  ;;  %v2888_v2 = vld [vmem:[%s5807_s1 + $0xe8] sm:$0xf0]  ;;  %v4529_v4 = vor.u32 %v3743_v60, %v2748_v61  ;;  %v3070_v5 = vld [vmem:[%s5807_s1 + $0x250] sm:$0xf]  ;;  %v3143_v7 = vor.u32 %v3843_v62, %v3142_v52 }
  0x36   : > { %1124 = vmatpush.bf16.msra.mxu0 %v2775_v34  ;;  %v3825_v6 = vld [vmem:[%s5807_s1 + $0x254] sm:$0xf0]  ;;  %v3760_v8 = vld [vmem:[%s5807_s1 + $0x54] sm:$0xf]  ;;  %v2816_v9 = vld [vmem:[%s5807_s1 + $0x58] sm:$0xf0]  ;;  %v2891_v10 = vor.u32 %v3778_v1, %v2888_v2 }
  0x37   : > { %1152 = vmatpush.bf16.msra.mxu2 %v2903_v37  ;;  %v3134_v11 = vld [vmem:[%s5807_s1 + $0x2d0] sm:$0xf]  ;;  %v3841_v12 = vld [vmem:[%s5807_s1 + $0x2d4] sm:$0xf0]  ;;  %v3071_v13 = vor.u32 %v3825_v6, %v3070_v5  ;;  %v3776_v14 = vld [vmem:[%s5807_s1 + $0xd4] sm:$0xf]  ;;  %v2819_v16 = vor.u32 %v3760_v8, %v2816_v9 }
  0x38   : > { %1166 = vmatpush.bf16.msra.mxu3 %v2967_v38  ;;  %v2880_v15 = vld [vmem:[%s5807_s1 + $0xd8] sm:$0xf0]  ;;  %v3062_v17 = vld [vmem:[%s5807_s1 + $0x240] sm:$0xf]  ;;  %v3823_v18 = vld [vmem:[%s5807_s1 + $0x244] sm:$0xf0]  ;;  %v3135_v19 = vor.u32 %v3841_v12, %v3134_v11 }
  0x39   : > { %1138 = vmatpush.bf16.msra.mxu1 %v2839_v47  ;;  %1125 = vmatmul.bf16.vlgmr.msra.gmra.mxu0 %v4514_v59  ;;  %v3758_v20 = vld [vmem:[%s5807_s1 + $0x44] sm:$0xf]  ;;  %v2808_v21 = vld [vmem:[%s5807_s1 + $0x48] sm:$0xf0]  ;;  %v2883_v22 = vor.u32 %v3776_v14, %v2880_v15  ;;  %v3126_v23 = vld [vmem:[%s5807_s1 + $0x2c0] sm:$0xf]  ;;  %v3063_v25 = vor.u32 %v3823_v18, %v3062_v17 }
  0x3a   : > { %1173 = vmatpush.bf16.msrb.mxu0 %v3087_v42  ;;  %1153 = vmatmul.bf16.vlgmr.msra.gmra.mxu2 %v4509_v53  ;;  %v3839_v24 = vld [vmem:[%s5807_s1 + $0x2c4] sm:$0xf0]  ;;  %v3774_v26 = vld [vmem:[%s5807_s1 + $0xc4] sm:$0xf]  ;;  %v2872_v27 = vld [vmem:[%s5807_s1 + $0xc8] sm:$0xf0]  ;;  %v2811_v28 = vor.u32 %v3758_v20, %v2808_v21 }
  0x3b   : > { %1208 = vmatpush.bf16.msrb.mxu2 %v3159_v50  ;;  %1167 = vmatmul.bf16.vlgmr.msra.gmra.mxu3 %v4521_v63  ;;  %v3054_v29 = vld [vmem:[%s5807_s1 + $0x230] sm:$0xf]  ;;  %v3821_v30 = vld [vmem:[%s5807_s1 + $0x234] sm:$0xf0]  ;;  %v3127_v31 = vor.u32 %v3839_v24, %v3126_v23  ;;  %v3756_v32 = vld [vmem:[%s5807_s1 + $0x34] sm:$0xf]  ;;  %v2875_v34 = vor.u32 %v3774_v26, %v2872_v27 }
  0x3c   : > { %1215 = vmatpush.bf16.msrb.mxu3 %v2835_v43  ;;  %1139 = vmatmul.bf16.vlgmr.msra.gmra.mxu1 %v4529_v4  ;;  %v2800_v33 = vld [vmem:[%s5807_s1 + $0x38] sm:$0xf0]  ;;  %v3118_v35 = vld [vmem:[%s5807_s1 + $0x2b0] sm:$0xf]  ;;  %v3837_v36 = vld [vmem:[%s5807_s1 + $0x2b4] sm:$0xf0]  ;;  %v3055_v38 = vor.u32 %v3821_v30, %v3054_v29 }
  0x3d   : > { %1187 = vmatpush.bf16.msrb.mxu1 %v3151_v54  ;;  %v3772_v37 = vld [vmem:[%s5807_s1 + $0xb4] sm:$0xf]  ;;  %v2864_v39 = vld [vmem:[%s5807_s1 + $0xb8] sm:$0xf0]  ;;  %v2770_v40 = vld [vmem:[%s4492_s21 + $0x18] sm:$0xf]  ;;  %v2803_v42 = vor.u32 %v3756_v32, %v2800_v33  ;;  %v3119_v45 = vor.u32 %v3837_v36, %v3118_v35 }
  0x3e   : > { %1174 = vmatpush.bf16.msrb.mxu0 %v3079_v0  ;;  %v3749_v41 = vld [vmem:[%s4492_s21 + $0x30] sm:$0xf0]  ;;  %v3046_v43 = vld [vmem:[%s5807_s1 + $0x220] sm:$0xf]  ;;  %v3819_v44 = vld [vmem:[%s5807_s1 + $0x224] sm:$0xf0]  ;;  %v2867_v49 = vor.u32 %v3772_v37, %v2864_v39 }
  0x3f   : > { %1229 = vmatpush.bf16.msra.mxu2 %v2899_v58  ;;  %v3754_v46 = vld [vmem:[%s5807_s1 + $0x24] sm:$0xf]  ;;  %v2792_v47 = vld [vmem:[%s5807_s1 + $0x28] sm:$0xf0]  ;;  %v4621_v48 = vor.u32 %v3749_v41, %v2770_v40  ;;  %v3110_v50 = vld [vmem:[%s5807_s1 + $0x2a0] sm:$0xf]  ;;  %v3047_v52 = vor.u32 %v3819_v44, %v3046_v43 }
  0x40   : > { %1216 = vmatpush.bf16.msrb.mxu3 %v2827_v3  ;;  %v3835_v51 = vld [vmem:[%s5807_s1 + $0x2a4] sm:$0xf0]  ;;  %v3770_v54 = vld [vmem:[%s5807_s1 + $0xa4] sm:$0xf]  ;;  %v2856_v55 = vld [vmem:[%s5807_s1 + $0xa8] sm:$0xf0]  ;;  %v2795_v56 = vor.u32 %v3754_v46, %v2792_v47 }
  0x41   : > { %1188 = vmatpush.bf16.msrb.mxu1 %v3143_v7  ;;  %v3038_v57 = vld [vmem:[%s5807_s1 + $0x210] sm:$0xf]  ;;  %v3817_v58 = vld [vmem:[%s5807_s1 + $0x214] sm:$0xf0]  ;;  %v3752_v60 = vld [vmem:[%s5807_s1 + $0x14] sm:$0xf]  ;;  %v3111_v61 = vor.u32 %v3835_v51, %v3110_v50  ;;  %v2859_v2 = vor.u32 %v3770_v54, %v2856_v55 }
  0x42   : > { %1175 = vmatpush.bf16.msrb.mxu0 %v3071_v13  ;;  %v2784_v62 = vld [vmem:[%s5807_s1 + $0x18] sm:$0xf0]  ;;  %v3102_v0 = vld [vmem:[%s5807_s1 + $0x290] sm:$0xf]  ;;  %v3833_v1 = vld [vmem:[%s5807_s1 + $0x294] sm:$0xf0]  ;;  %v3039_v7 = vor.u32 %v3817_v58, %v3038_v57 }
  0x43   : > { %1230 = vmatpush.bf16.msra.mxu2 %v2891_v10  ;;  %v3768_v3 = vld [vmem:[%s5807_s1 + $0x94] sm:$0xf]  ;;  %v2848_v5 = vld [vmem:[%s5807_s1 + $0x98] sm:$0xf0]  ;;  %v3030_v6 = vld [vmem:[%s5807_s1 + $0x200] sm:$0xf]  ;;  %v2787_v11 = vor.u32 %v3752_v60, %v2784_v62  ;;  %v3103_v15 = vor.u32 %v3833_v1, %v3102_v0 }
  0x44   : > { %1217 = vmatpush.bf16.msrb.mxu3 %v2819_v16  ;;  %v3815_v8 = vld [vmem:[%s5807_s1 + $0x204] sm:$0xf0]  ;;  %v3750_v9 = vld [vmem:[%s5807_s1 + $0x4] sm:$0xf]  ;;  %v2776_v10 = vld [vmem:[%s5807_s1 + $0x8] sm:$0xf0] }
  0x45   : > { %1189 = vmatpush.bf16.msrb.mxu1 %v3135_v19  ;;  %v3796_v12 = vld [vmem:[%s5807_s1 + $0x174] sm:$0xf]  ;;  %v2960_v13 = vld [vmem:[%s5807_s1 + $0x178] sm:$0xf0]  ;;  %v3094_v17 = vld [vmem:[%s5807_s1 + $0x280] sm:$0xf]  ;;  %v2851_v19 = vor.u32 %v3768_v3, %v2848_v5  ;;  %v3031_v23 = vor.u32 %v3815_v8, %v3030_v6  ;;  %v2779_v27 = vor.u32 %v3750_v9, %v2776_v10 }
  0x46   : > { %1176 = vmatpush.bf16.msrb.mxu0 %v3063_v25  ;;  %v3828_v14 = vld [vmem:[%s5807_s1 + $0x274] sm:$0xf]  ;;  %v3088_v16 = vld [vmem:[%s5807_s1 + $0x278] sm:$0xf0]  ;;  %v3831_v18 = vld [vmem:[%s5807_s1 + $0x284] sm:$0xf0] }
  0x47   : > { %1231 = vmatpush.bf16.msra.mxu2 %v2883_v22  ;;  %v2762_v20 = vld [vmem:[%s4492_s21 + $0x10] sm:$0xf]  ;;  %v3748_v21 = vld [vmem:[%s4492_s21 + $0x28] sm:$0xf0]  ;;  %v3766_v22 = vld [vmem:[%s5807_s1 + $0x84] sm:$0xf]  ;;  %v3091_v32 = vor.u32 %v3828_v14, %v3088_v16  ;;  %v3095_v33 = vor.u32 %v3831_v18, %v3094_v17 }
  0x48   : > { %1218 = vmatpush.bf16.msrb.mxu3 %v2811_v28  ;;  %v2840_v24 = vld [vmem:[%s5807_s1 + $0x88] sm:$0xf0]  ;;  %v3812_v25 = vld [vmem:[%s5807_s1 + $0x1f4] sm:$0xf]  ;;  %v3024_v26 = vld [vmem:[%s5807_s1 + $0x1f8] sm:$0xf0]  ;;  %v2963_v28 = vor.u32 %v3796_v12, %v2960_v13  ;;  %v4719_v37 = vor.u32 %v3748_v21, %v2762_v20 }
  0x49   : > { %1190 = vmatpush.bf16.msrb.mxu1 %v3127_v31  ;;  %v3844_v29 = vld [vmem:[%s5807_s1 + $0x2f4] sm:$0xf]  ;;  %v3152_v30 = vld [vmem:[%s5807_s1 + $0x2f8] sm:$0xf0]  ;;  %v3794_v35 = vld [vmem:[%s5807_s1 + $0x164] sm:$0xf]  ;;  %v3027_v41 = vor.u32 %v3812_v25, %v3024_v26 }
  0x4a   : > { %1177 = vmatpush.bf16.msrb.mxu0 %v3055_v38  ;;  %3164 = vmatmul.msk.bf16.vlgmr.msrb.gmra.mxu2 %vm1113_vm0, %v4621_v48  ;;  %v3745_v31 = vld [vmem:[%s4492_s21 + $0x14] sm:$0xf]  ;;  %v2952_v36 = vld [vmem:[%s5807_s1 + $0x168] sm:$0xf0]  ;;  %v2843_v38 = vor.u32 %v3766_v22, %v2840_v24  ;;  %v3826_v39 = vld [vmem:[%s5807_s1 + $0x264] sm:$0xf] }
  0x4b   : > { %1232 = vmatpush.bf16.msra.mxu2 %v2875_v34  ;;  %v2764_v34 = vld [vmem:[%s4492_s21 + $0x2c] sm:$0xf0]  ;;  %v3080_v40 = vld [vmem:[%s5807_s1 + $0x268] sm:$0xf0]  ;;  %v3810_v43 = vld [vmem:[%s5807_s1 + $0x1e4] sm:$0xf] }
  0x4c   : > { %1219 = vmatpush.bf16.msrb.mxu3 %v2803_v42  ;;  %v3155_v42 = vor.u32 %v3844_v29, %v3152_v30  ;;  %v4730_v44 = vor.u32 %v3745_v31, %v2764_v34  ;;  %v3016_v46 = vld [vmem:[%s5807_s1 + $0x1e8] sm:$0xf0]  ;;  %v3842_v47 = vld [vmem:[%s5807_s1 + $0x2e4] sm:$0xf]  ;;  %v3083_v50 = vor.u32 %v3826_v39, %v3080_v40  ;;  %v3792_v51 = vld [vmem:[%s5807_s1 + $0x154] sm:$0xf] }
  0x4d   : > { %1191 = vmatpush.bf16.msrb.mxu1 %v3119_v45  ;;  %v2955_v45 = vor.u32 %v3794_v35, %v2952_v36  ;;  %v3824_v54 = vld [vmem:[%s5807_s1 + $0x254] sm:$0xf]  ;;  %v3072_v55 = vld [vmem:[%s5807_s1 + $0x258] sm:$0xf0]  ;;  %v2936_v3 = vld [vmem:[%s5807_s1 + $0x148] sm:$0xf0] }
  0x4e   : > { %1178 = vmatpush.bf16.msrb.mxu0 %v3047_v52  ;;  %v2944_v52 = vld [vmem:[%s5807_s1 + $0x158] sm:$0xf0]  ;;  %v3808_v58 = vld [vmem:[%s5807_s1 + $0x1d4] sm:$0xf]  ;;  %v3075_v1 = vor.u32 %v3824_v54, %v3072_v55  ;;  %v3822_v5 = vld [vmem:[%s5807_s1 + $0x244] sm:$0xf] }
  0x4f   : > { %1233 = vmatpush.bf16.msra.mxu2 %v2867_v49  ;;  %v3144_v49 = vld [vmem:[%s5807_s1 + $0x2e8] sm:$0xf0]  ;;  %v2947_v60 = vor.u32 %v3792_v51, %v2944_v52  ;;  %v3840_v62 = vld [vmem:[%s5807_s1 + $0x2d4] sm:$0xf]  ;;  %v3136_v0 = vld [vmem:[%s5807_s1 + $0x2d8] sm:$0xf0] }
  0x50   : > { %1220 = vmatpush.bf16.msrb.mxu3 %v2795_v56  ;;  %v3019_v56 = vor.u32 %v3810_v43, %v3016_v46  ;;  %v3147_v57 = vor.u32 %v3842_v47, %v3144_v49  ;;  %v3064_v6 = vld [vmem:[%s5807_s1 + $0x248] sm:$0xf0]  ;;  %v3139_v8 = vor.u32 %v3840_v62, %v3136_v0  ;;  %v3806_v9 = vld [vmem:[%s5807_s1 + $0x1c4] sm:$0xf]  ;;  %v3788_v12 = vld [vmem:[%s5807_s1 + $0x134] sm:$0xf] }
  0x51   : > { %1192 = vmatpush.bf16.msrb.mxu1 %v3111_v61  ;;  %v3008_v61 = vld [vmem:[%s5807_s1 + $0x1d8] sm:$0xf0]  ;;  %v3067_v13 = vor.u32 %v3822_v5, %v3064_v6  ;;  %v3836_v22 = vld [vmem:[%s5807_s1 + $0x2b4] sm:$0xf]  ;;  %v3786_v25 = vld [vmem:[%s5807_s1 + $0x124] sm:$0xf] }
  0x52   : > { %1179 = vmatpush.bf16.msrb.mxu0 %v3039_v7  ;;  %v3011_v7 = vor.u32 %v3808_v58, %v3008_v61  ;;  %v2928_v14 = vld [vmem:[%s5807_s1 + $0x138] sm:$0xf0]  ;;  %v2920_v26 = vld [vmem:[%s5807_s1 + $0x128] sm:$0xf0]  ;;  %v3802_v31 = vld [vmem:[%s5807_s1 + $0x1a4] sm:$0xf] }
  0x53   : > { %1234 = vmatpush.bf16.msra.mxu2 %v2859_v2  ;;  %v3790_v2 = vld [vmem:[%s5807_s1 + $0x144] sm:$0xf]  ;;  %v3056_v16 = vld [vmem:[%s5807_s1 + $0x238] sm:$0xf0]  ;;  %v2931_v20 = vor.u32 %v3788_v12, %v2928_v14  ;;  %v3112_v35 = vld [vmem:[%s5807_s1 + $0x2a8] sm:$0xf0] }
  0x54   : > { %1221 = vmatpush.bf16.msrb.mxu3 %v2787_v11  ;;  %v2939_v10 = vor.u32 %v3790_v2, %v2936_v3  ;;  %v3838_v11 = vld [vmem:[%s5807_s1 + $0x2c4] sm:$0xf]  ;;  %v2992_v21 = vld [vmem:[%s5807_s1 + $0x1b8] sm:$0xf0]  ;;  %v3816_v40 = vld [vmem:[%s5807_s1 + $0x214] sm:$0xf] }
  0x55   : > { %1193 = vmatpush.bf16.msrb.mxu1 %v3103_v15  ;;  %v3820_v15 = vld [vmem:[%s5807_s1 + $0x234] sm:$0xf]  ;;  %v3834_v34 = vld [vmem:[%s5807_s1 + $0x2a4] sm:$0xf]  ;;  %v2912_v39 = vld [vmem:[%s5807_s1 + $0x118] sm:$0xf0] }
  0x56   : > { %1180 = vmatpush.bf16.msrb.mxu0 %v3031_v23  ;;  %v3120_v23 = vld [vmem:[%s5807_s1 + $0x2b8] sm:$0xf0]  ;;  %v3059_v24 = vor.u32 %v3820_v15, %v3056_v16  ;;  %v3115_v43 = vor.u32 %v3834_v34, %v3112_v35  ;;  %v3832_v49 = vld [vmem:[%s5807_s1 + $0x294] sm:$0xf]  ;;  %v3782_v52 = vld [vmem:[%s5807_s1 + $0x104] sm:$0xf] }
  0x57   : > { %1235 = vmatpush.bf16.msra.mxu2 %v2851_v19  ;;  %v3804_v19 = vld [vmem:[%s5807_s1 + $0x1b4] sm:$0xf]  ;;  %v3123_v30 = vor.u32 %v3836_v22, %v3120_v23  ;;  %v2976_v47 = vld [vmem:[%s5807_s1 + $0x198] sm:$0xf0]  ;;  %v2904_v54 = vld [vmem:[%s5807_s1 + $0x108] sm:$0xf0] }
  0x58   : > { %1222 = vmatpush.bf16.msrb.mxu3 %v2779_v27  ;;  %v3818_v27 = vld [vmem:[%s5807_s1 + $0x224] sm:$0xf]  ;;  %v2995_v29 = vor.u32 %v3804_v19, %v2992_v21  ;;  %v3160_v58 = vld [vmem:[%s5807_s1 + $0x308] sm:$0xf0]  ;;  %v2907_v62 = vor.u32 %v3782_v52, %v2904_v54  ;;  %v3863_v22 = vld [vmem:[%s5809_s3 + $0x78] sm:$0xff]  ;;  %vm2645_vm2 = vcmask 125952  }
  0x59   : > { %1194 = vmatpush.bf16.msrb.mxu1 %v3095_v33  ;;  %1181 = vmatmul.bf16.vlgmr.msrb.gmra.mxu0 %v4719_v37  ;;  %v2984_v33 = vld [vmem:[%s5807_s1 + $0x1a8] sm:$0xf0]  ;;  %v3814_v55 = vld [vmem:[%s5807_s1 + $0x204] sm:$0xf]  ;;  %s2660_s23 = ssub.s32 (%p4249_p5), 3, %s4434_s15 }
  0x5a   : > { %1243 = vmatpush.bf16.msra.mxu0 %v2963_v28  ;;  %v3048_v28 = vld [vmem:[%s5807_s1 + $0x228] sm:$0xf0]  ;;  %v3798_v0 = vld [vmem:[%s5807_s1 + $0x184] sm:$0xf]  ;;  %p2661_p11 = scmp.lt.s32.totalorder (%p4249_p5), %s2660_s23, 2 }
  0x5b   : > { %1236 = vmatpush.bf16.msra.mxu2 %v2843_v38  ;;  %1223 = vmatmul.bf16.vlgmr.msrb.gmra.mxu3 %v4514_v59  ;;  %v3128_v59 = vld [vmem:[%s5807_s1 + $0x2c8] sm:$0xf0]  ;;  %v3051_v36 = vor.u32 %v3818_v27, %v3048_v28  ;;  %v3784_v38 = vld [vmem:[%s5807_s1 + $0x114] sm:$0xf]  ;;  %v3830_v3 = vld [vmem:[%s5807_s1 + $0x284] sm:$0xf] }
  0x5c   : > { %1271 = vmatpush.bf16.msra.mxu3 %v3091_v32  ;;  %1195 = vmatmul.bf16.vlgmr.msrb.gmra.mxu1 %v4730_v44  ;;  %v3131_v18 = vor.u32 %v3838_v11, %v3128_v59  ;;  %v2923_v32 = vor.u32 %v3786_v25, %v2920_v26  ;;  %v2915_v46 = vor.u32 %v3784_v38, %v2912_v39  ;;  %v3096_v5 = vld [vmem:[%s5807_s1 + $0x288] sm:$0xf0]  ;;  %v3848_v12 = vld [vmem:[%s5809_s3] sm:$0xff]  ;;  %v3862_v27 = vld [vmem:[%s5809_s3 + $0x70] sm:$0xff] }
  0x5d   : > { %1257 = vmatpush.bf16.msra.mxu1 %v3027_v41  ;;  %v3040_v41 = vld [vmem:[%s5807_s1 + $0x218] sm:$0xf0]  ;;  %v3860_v38 = vld [vmem:[%s5809_s3 + $0x60] sm:$0xff]  ;;  %v3857_v54 = vld [vmem:[%s5809_s3 + $0x48] sm:$0xff] }
  0x5e   : > { %1244 = vmatpush.bf16.msra.mxu0 %v2955_v45  ;;  %1237 = vmatmul.bf16.vlgmr.msra.gmra.mxu2 %v4529_v4  ;;  %v3000_v4 = vld [vmem:[%s5807_s1 + $0x1c8] sm:$0xf0]  ;;  %v3800_v45 = vld [vmem:[%s5807_s1 + $0x194] sm:$0xf]  ;;  %v3043_v51 = vor.u32 %v3816_v40, %v3040_v41 }
  0x5f   : > { %1285 = vmatpush.bf16.msrb.mxu2 %v3155_v42  ;;  %v3003_v17 = vor.u32 %v3806_v9, %v3000_v4  ;;  %v2987_v42 = vor.u32 %v3802_v31, %v2984_v33  ;;  %v3855_v9 = vld [vmem:[%s5809_s3 + $0x38] sm:$0xff]  ;;  %v3854_v4 = vld [vmem:[%s5809_s3 + $0x30] sm:$0xff]  ;;  %v3861_v33 = vld [vmem:[%s5809_s3 + $0x68] sm:$0xff] }
  0x60   : > { %1272 = vmatpush.bf16.msra.mxu3 %v3083_v50  ;;  %v3104_v50 = vld [vmem:[%s5807_s1 + $0x298] sm:$0xf0] }
  0x61   : > { %1258 = vmatpush.bf16.msra.mxu1 %v3019_v56  ;;  %v3032_v56 = vld [vmem:[%s5807_s1 + $0x208] sm:$0xf0]  ;;  %v3107_v61 = vor.u32 %v3832_v49, %v3104_v50  ;;  %v3858_v50 = vld [vmem:[%s5809_s3 + $0x50] sm:$0xff] }
  0x62   : > { %1245 = vmatpush.bf16.msra.mxu0 %v2947_v60  ;;  %v2979_v60 = vor.u32 %v3800_v45, %v2976_v47  ;;  %v3035_v2 = vor.u32 %v3814_v55, %v3032_v56  ;;  %v3859_v45 = vld [vmem:[%s5809_s3 + $0x58] sm:$0xff]  ;;  %v3856_v56 = vld [vmem:[%s5809_s3 + $0x40] sm:$0xff] }
  0x63   : > { %1286 = vmatpush.bf16.msrb.mxu2 %v3147_v57  ;;  %v3846_v57 = vld [vmem:[%s5807_s1 + $0x304] sm:$0xf] }
  0x64   : > { %1273 = vmatpush.bf16.msra.mxu3 %v3075_v1  ;;  %v2968_v1 = vld [vmem:[%s5807_s1 + $0x188] sm:$0xf0]  ;;  %v3163_v6 = vor.u32 %v3846_v57, %v3160_v58 }
  0x65   : > { %1259 = vmatpush.bf16.msra.mxu1 %v3011_v7  ;;  %v2971_v7 = vor.u32 %v3798_v0, %v2968_v1 }
  0x66   : > { %1246 = vmatpush.bf16.msra.mxu0 %v2939_v10  ;;  %v582_v10 = vld [vmem:[%s5808_s2] sm:$0x3] }
  0x67   : > { %1287 = vmatpush.bf16.msrb.mxu2 %v3139_v8  ;;  %v3099_v8 = vor.u32 %v3830_v3, %v3096_v5  ;;  %v584_v14 = vperm.slane %v582_v10, 0  ;;  %v585_v57 = vperm.slane %v582_v10, 1 }
  0x68   : > { %1274 = vmatpush.bf16.msra.mxu3 %v3067_v13 }
  0x69   : > { %1260 = vmatpush.bf16.msra.mxu1 %v3003_v17 }
  0x6a   : > { %1247 = vmatpush.bf16.msra.mxu0 %v2931_v20 }
  0x6b   : > { %1288 = vmatpush.bf16.msrb.mxu2 %v3131_v18 }
  0x6c   : > { %1275 = vmatpush.bf16.msra.mxu3 %v3059_v24 }
  0x6d   : > { %1261 = vmatpush.bf16.msra.mxu1 %v2995_v29 }
  0x6e   : > { %1248 = vmatpush.bf16.msra.mxu0 %v2923_v32 }
  0x6f   : > { %1289 = vmatpush.bf16.msrb.mxu2 %v3123_v30 }
  0x70   : > { %1276 = vmatpush.bf16.msra.mxu3 %v3051_v36 }
  0x71   : > { %1262 = vmatpush.bf16.msra.mxu1 %v2987_v42 }
  0x72   : > { %1249 = vmatpush.bf16.msra.mxu0 %v2915_v46 }
  0x73   : > { %1290 = vmatpush.bf16.msrb.mxu2 %v3115_v43 }
  0x74   : > { %1277 = vmatpush.bf16.msra.mxu3 %v3043_v51 }
  0x75   : > { %1263 = vmatpush.bf16.msra.mxu1 %v2979_v60 }
  0x76   : > { %1250 = vmatpush.bf16.msra.mxu0 %v2907_v62 }
  0x77   : > { %1291 = vmatpush.bf16.msrb.mxu2 %v3107_v61 }
  0x78   : > { %1278 = vmatpush.bf16.msra.mxu3 %v3035_v2 }
  0x79   : > { %1264 = vmatpush.bf16.msra.mxu1 %v2971_v7  ;;  %1251 = vmatmul.bf16.vlgmr.msra.gmra.mxu0 %v4509_v53  ;;  %v3853_v53 = vld [vmem:[%s5809_s3 + $0x28] sm:$0xff] }
  0x7a   : > { %1306 = vmatpush.bf16.msrb.mxu0 %v3163_v6 }
  0x7b   : > { %1279 = vmatmul.bf16.vlgmr.msra.gmra.mxu3 %v4719_v37  ;;  %1292 = vmatpush.bf16.msrb.mxu2 %v3099_v8  ;;  %v3850_v37 = vld [vmem:[%s5809_s3 + $0x10] sm:$0xff] }
  0x7c   : > { %1265 = vmatmul.bf16.vlgmr.msra.gmra.mxu1 %v4521_v63  ;;  %v3852_v63 = vld [vmem:[%s5809_s3 + $0x20] sm:$0xff]  ;;  %1465 = vmatpush.bf16.msrb.mxu3 %v3863_v22 }
  0x7d   : > { %1451 = vmatpush.bf16.msrb.mxu1 %v3855_v9  ;;  %v3864_v22 = vld [vmem:[%s5811_s5] sm:$0xff] }
  0x7e   : > { %1293 = vmatmul.bf16.vlgmr.msrb.gmra.mxu2 %v4730_v44  ;;  %v3849_v44 = vld [vmem:[%s5809_s3 + $0x8] sm:$0xff] }
  0x80   : > { %1466 = vmatpush.bf16.msrb.mxu3 %v3862_v27 }
  0x81   : > { %1452 = vmatpush.bf16.msrb.mxu1 %v3854_v4 }
  0x84   : > { %1467 = vmatpush.bf16.msrb.mxu3 %v3861_v33 }
  0x85   : > { %1453 = vmatpush.bf16.msrb.mxu1 %v3853_v53 }
  0x88   : > { %1468 = vmatpush.bf16.msrb.mxu3 %v3860_v38  ;;  %v4033_v38 = vld [vmem:[%s5812_s6] ss:$0 sm:$0xff] }
  0x89   : > { %3165 = vmatmul.msk.bf16.vlgmr.msrb.gmra.mxu0 %vm1113_vm0, %v4621_v48  ;;  %1454 = vmatpush.bf16.msrb.mxu1 %v3852_v63  ;;  %v3851_v48 = vld [vmem:[%s5809_s3 + $0x18] sm:$0xff] }
  0x8c   : > { %1469 = vmatpush.bf16.msrb.mxu3 %v3859_v45 }
  0x8d   : > { %1455 = vmatpush.bf16.msrb.mxu1 %v3851_v48 }
  0x90   : > { %1470 = vmatpush.bf16.msrb.mxu3 %v3858_v50 }
  0x91   : > { %1456 = vmatpush.bf16.msrb.mxu1 %v3850_v37 }
  0x94   : > { %1471 = vmatpush.bf16.msrb.mxu3 %v3857_v54  ;;  %v3270_v54 = vld [vmem:[%s5815_s9 + $0x20] sm:$0xf] }
  0x95   : > { %1457 = vmatpush.bf16.msrb.mxu1 %v3849_v44 }
  0x98   : > { %1472 = vmatpush.bf16.msrb.mxu3 %v3856_v56  ;;  %v3873_v56 = vld [vmem:[%s5815_s9 + $0x24] sm:$0xf] }
  0x99   : > { %1458 = vmatpush.bf16.msrb.mxu1 %v3848_v12 }
  0xb6   : > { %v1126_v11 = vpop.f32.mrf.mxu0 }
  0xb7   : > { %v1127_v15 = vadd.f32 %v1126_v11, %v584_v14 }
  0xb9   : > { %v1140_v13 = vpop.f32.mrf.mxu1 }
  0xba   : > { %v1141_v18 = vadd.f32 %v1140_v13, %v1127_v15 }
  0xbd   : > { %v1154_v59 = vpop.f32.mrf.mxu2 }
  0xbe   : > { %v1128_v16 = vpop.f32.mrf.mxu0  ;;  %v1168_v19 = vpop.f32.mrf.mxu3  ;;  %v1155_v23 = vadd.f32 %v1154_v59, %v1141_v18 }
  0xbf   : > { %v1129_v21 = vadd.f32 %v1128_v16, %v584_v14 }
  0xc0   : > { %v1169_v28 = vadd.f32 %v1168_v19, %v1155_v23  ;;  %v3867_v19 = vld [vmem:[%s5811_s5 + $0x18] sm:$0xff] }
  0xc1   : > { %v1142_v20 = vpop.f32.mrf.mxu1  ;;  %1526 = vmatpush.bf16.msra.mxu0 %v3867_v19  ;;  %v3978_v19 = vld [vmem:[%s5817_s11 + $0x328] sm:$0xf0] }
  0xc2   : > { %v1143_v24 = vadd.f32 %v1142_v20, %v1129_v21  ;;  %v3866_v20 = vld [vmem:[%s5811_s5 + $0x10] sm:$0xff]  ;;  %v3865_v21 = vld [vmem:[%s5811_s5 + $0x8] sm:$0xff] }
  0xc5   : > { %v1156_v17 = vpop.f32.mrf.mxu2  ;;  %1527 = vmatpush.bf16.msra.mxu0 %v3866_v20 }
  0xc6   : > { %v1157_v30 = vadd.f32 %v1156_v17, %v1143_v24  ;;  %v1170_v32 = vpop.f32.mrf.mxu3 }
  0xc8   : > { %v1171_v34 = vadd.f32 %v1170_v32, %v1157_v30 }
  0xc9   : > { %1528 = vmatpush.bf16.msra.mxu0 %v3865_v21 }
  0xcd   : > { %v1210_v26 = vpop.f32.mrf.mxu2  ;;  %1529 = vmatpush.bf16.msra.mxu0 %v3864_v22  ;;  %v3919_v22 = vld [vmem:[%s5817_s11 + $0x154] sm:$0xf] }
  0xd5   : > { %v1212_v41 = vpop.f32.mrf.mxu2 }
  0xd6   : > { %v1182_v25 = vpop.f32.mrf.mxu0 }
  0xd7   : > { %v1183_v31 = vadd.f32 %v1182_v25, %v1169_v28  ;;  %v4032_v25 = vld [vmem:[%s5810_s4] ss:$0 sm:$0xff] }
  0xd9   : > { %v1196_v29 = vpop.f32.mrf.mxu1 }
  0xda   : > { %v1197_v35 = vadd.f32 %v1196_v29, %v1183_v31 }
  0xdc   : > { %v1211_v42 = vadd.f32 %v1210_v26, %v1197_v35  ;;  %v3868_v35 = vld [vmem:[%s5813_s7] sm:$0xff] }
  0xdd   : > { %1561 = vmatpush.bf16.msra.mxu2 %v3868_v35  ;;  %v3968_v35 = vld [vmem:[%s5817_s11 + $0x2dc] sm:$0xf] }
  0xde   : > { %v1184_v36 = vpop.f32.mrf.mxu0  ;;  %v1313_v47 = vmax.f32 %v1211_v42, 0.0  ;;  %v1224_v52 = vpop.f32.mrf.mxu3 }
  0xdf   : > { %v1185_v39 = vadd.f32 %v1184_v36, %v1171_v34  ;;  %v1225_v62 = vadd.f32 %v1224_v52, %v585_v57 }
  0xe1   : > { %v1198_v40 = vpop.f32.mrf.mxu1  ;;  %v1238_v55 = vpop.f32.mrf.mxu2 }
  0xe2   : > { %v1199_v43 = vadd.f32 %v1198_v40, %v1185_v39  ;;  %v1239_v1 = vadd.f32 %v1238_v55, %v1225_v62  ;;  %v3874_v55 = vld [vmem:[%s5815_s9 + $0x24] sm:$0xf0]  ;;  %v3872_v62 = vld [vmem:[%s5815_s9 + $0x14] sm:$0xf0] }
  0xe4   : > { %v1213_v46 = vadd.f32 %v1212_v41, %v1199_v43 }
  0xe6   : > { %v1315_v49 = vmax.f32 %v1213_v46, 0.0  ;;  %v1226_v58 = vpop.f32.mrf.mxu3  ;;  %v3278_v46 = vld [vmem:[%s5815_s9 + $0x30] sm:$0xf] }
  0xe7   : > { %v1227_v2 = vadd.f32 %v1226_v58, %v585_v57  ;;  %v3271_v57 = vor.u32 %v3874_v55, %v3270_v54  ;;  %v3272_v58 = vld [vmem:[%s5815_s9 + $0x28] sm:$0xf0]  ;;  %v3372_v55 = vld [vmem:[%s5817_s11 + $0xa8] sm:$0xf] }
  0xe8   : > { %v1317_v51 = vpack.c.bf16 %v1315_v49, %v1313_v47  ;;  %v3876_v47 = vld [vmem:[%s5815_s9 + $0x34] sm:$0xf0]  ;;  %v3875_v49 = vld [vmem:[%s5815_s9 + $0x34] sm:$0xf] }
  0xe9   : > { %v1240_v61 = vpop.f32.mrf.mxu2  ;;  %v3279_v50 = vor.u32 %v3876_v47, %v3278_v46  ;;  %v3905_v46 = vld [vmem:[%s5817_s11 + $0xe4] sm:$0xf]  ;;  %v3402_v47 = vld [vmem:[%s5817_s11 + $0xfc] sm:$0xf0] }
  0xea   : > { %1459 = vmatmul.bf16.vlgmr.msrb.gmra.mxu1 %v1317_v51  ;;  %v1241_v7 = vadd.f32 %v1240_v61, %v1227_v2  ;;  %v3280_v51 = vld [vmem:[%s5815_s9 + $0x38] sm:$0xf0]  ;;  %v3262_v61 = vld [vmem:[%s5815_s9 + $0x10] sm:$0xf]  ;;  %v3405_v54 = vor.u32 %v3905_v46, %v3402_v47  ;;  %v3927_v46 = vld [vmem:[%s5817_s11 + $0x194] sm:$0xf] }
  0xeb   : > { %v3283_v52 = vor.u32 %v3875_v49, %v3280_v51  ;;  %1632 = vmatpush.bf16.msrb.mxu0 %v3279_v50  ;;  %v3264_v2 = vld [vmem:[%s5815_s9 + $0x18] sm:$0xf0]  ;;  %v3961_v49 = vld [vmem:[%s5817_s11 + $0x2a4] sm:$0xf]  ;;  %v3626_v50 = vld [vmem:[%s5817_s11 + $0x2bc] sm:$0xf0] }
  0xec   : > { %v3494_v47 = vld [vmem:[%s5817_s11 + $0x1ac] sm:$0xf0] }
  0xed   : > { %1646 = vmatpush.bf16.msra.mxu1 %v3283_v52 }
  0xef   : > { %1633 = vmatpush.bf16.msrb.mxu0 %v3271_v57  ;;  %v3596_v57 = vld [vmem:[%s5817_s11 + $0x268] sm:$0xf] }
  0xf6   : > { %v1252_v60 = vpop.f32.mrf.mxu0 }
  0xf7   : > { %v1253_v8 = vadd.f32 %v1252_v60, %v1239_v1  ;;  %v3275_v60 = vor.u32 %v3873_v56, %v3272_v58  ;;  %v3263_v1 = vor.u32 %v3872_v62, %v3262_v61  ;;  %v3901_v56 = vld [vmem:[%s5817_s11 + $0xc0] sm:$0xf0]  ;;  %v3629_v58 = vor.u32 %v3961_v49, %v3626_v50  ;;  %v3898_v61 = vld [vmem:[%s5817_s11 + $0xac] sm:$0xf]  ;;  %v3374_v62 = vld [vmem:[%s5817_s11 + $0xc4] sm:$0xf0] }
  0xf9   : > { %v1266_v0 = vpop.f32.mrf.mxu1  ;;  %1647 = vmatpush.bf16.msra.mxu1 %v3275_v60  ;;  %1634 = vmatpush.bf16.msrb.mxu0 %v3263_v1  ;;  %v3957_v60 = vld [vmem:[%s5817_s11 + $0x280] sm:$0xf0]  ;;  %v3598_v1 = vld [vmem:[%s5817_s11 + $0x284] sm:$0xf0] }
  0xfa   : > { %v1267_v53 = vadd.f32 %v1266_v0, %v1253_v8  ;;  %v3871_v0 = vld [vmem:[%s5815_s9 + $0x14] sm:$0xf] }
  0xfe   : > { %v1280_v3 = vpop.f32.mrf.mxu3  ;;  %v1254_v5 = vpop.f32.mrf.mxu0 }
  0xff   : > { %v1255_v9 = vadd.f32 %v1254_v5, %v1241_v7  ;;  %v1281_v37 = vadd.f32 %v1280_v3, %v1267_v53  ;;  %v3267_v3 = vor.u32 %v3871_v0, %v3264_v2  ;;  %v3254_v5 = vld [vmem:[%s5815_s9] sm:$0xf]  ;;  %v3869_v7 = vld [vmem:[%s5815_s9 + $0x4] sm:$0xf]  ;;  %v3484_v53 = vld [vmem:[%s5817_s11 + $0x188] sm:$0xf]  ;;  %v3373_v2 = vor.u32 %v3901_v56, %v3372_v55 }
 0x100   : > { %v3954_v0 = vld [vmem:[%s5817_s11 + $0x26c] sm:$0xf] }
 0x101   : > { %v1294_v6 = vpop.f32.mrf.mxu2  ;;  %v1268_v4 = vpop.f32.mrf.mxu1  ;;  %1648 = vmatpush.bf16.msra.mxu1 %v3267_v3  ;;  %v3597_v3 = vor.u32 %v3957_v60, %v3596_v57  ;;  %v3464_v60 = vld [vmem:[%s5817_s11 + $0x158] sm:$0xf] }
 0x102   : > { %v1269_v44 = vadd.f32 %v1268_v4, %v1255_v9  ;;  %v1295_v59 = vadd.f32 %v1294_v6, %v1281_v37  ;;  %v3870_v6 = vld [vmem:[%s5815_s9 + $0x4] sm:$0xf0]  ;;  %v3256_v9 = vld [vmem:[%s5815_s9 + $0x8] sm:$0xf0] }
 0x103   : > { %v3255_v8 = vor.u32 %v3870_v6, %v3254_v5  ;;  %v3259_v4 = vor.u32 %v3869_v7, %v3256_v9  ;;  %v3377_v5 = vor.u32 %v3898_v61, %v3374_v62  ;;  %v3344_v6 = vld [vmem:[%s5817_s11 + $0x70] sm:$0xf]  ;;  %v3894_v7 = vld [vmem:[%s5817_s11 + $0x88] sm:$0xf0]  ;;  %v3923_v61 = vld [vmem:[%s5817_s11 + $0x170] sm:$0xf0] }
 0x104   : > { %v3688_v62 = vld [vmem:[%s5817_s11 + $0x318] sm:$0xf] }
 0x105   : > { %1635 = vmatpush.bf16.msrb.mxu0 %v3255_v8  ;;  %1649 = vmatpush.bf16.msra.mxu1 %v3259_v4  ;;  %v3568_v8 = vld [vmem:[%s5817_s11 + $0x230] sm:$0xf]  ;;  %v3601_v4 = vor.u32 %v3954_v0, %v3598_v1  ;;  %v3979_v1 = vld [vmem:[%s5817_s11 + $0x330] sm:$0xf0] }
 0x106   : > { %v1282_v63 = vpop.f32.mrf.mxu3  ;;  %v1308_v48 = vpop.f32.mrf.mxu0 }
 0x107   : > { %v1283_v10 = vadd.f32 %v1282_v63, %v1269_v44  ;;  %v1309_v12 = vadd.f32 %v1308_v48, %v1295_v59  ;;  %v3929_v63 = vld [vmem:[%s5817_s11 + $0x1a0] sm:$0xf0]  ;;  %v3708_v48 = vld [vmem:[%s5817_s11 + $0x348] sm:$0xf] }
 0x108   : > { %v3485_v37 = vor.u32 %v3929_v63, %v3484_v53  ;;  %v3985_v44 = vld [vmem:[%s5817_s11 + $0x360] sm:$0xf0]  ;;  %v3950_v53 = vld [vmem:[%s5817_s11 + $0x248] sm:$0xf0]  ;;  %v3891_v63 = vld [vmem:[%s5817_s11 + $0x74] sm:$0xf] }
 0x109   : > { %v1296_v11 = vpop.f32.mrf.mxu2  ;;  %v1314_v16 = vmax.f32 %v1309_v12, 0.0  ;;  %v3709_v59 = vor.u32 %v3985_v44, %v3708_v48  ;;  %v3346_v48 = vld [vmem:[%s5817_s11 + $0x8c] sm:$0xf0] }
 0x10a   : > { %v1297_v13 = vadd.f32 %v1296_v11, %v1283_v10  ;;  %v3926_v10 = vld [vmem:[%s5817_s11 + $0x18c] sm:$0xf]  ;;  %v3486_v11 = vld [vmem:[%s5817_s11 + $0x1a4] sm:$0xf0]  ;;  %2382 = vmatpush.bf16.msrb.mxu2 %v3485_v37  ;;  %v3947_v37 = vld [vmem:[%s5817_s11 + $0x234] sm:$0xf] }
 0x10b   : > { %v3489_v12 = vor.u32 %v3926_v10, %v3486_v11  ;;  %2396 = vmatpush.bf16.msra.mxu3 %v3709_v59  ;;  %v3570_v44 = vld [vmem:[%s5817_s11 + $0x24c] sm:$0xf0]  ;;  %v4034_v10 = vld [vmem:[%s5814_s8] ss:$0 sm:$0xff]  ;;  %v3345_v11 = vor.u32 %v3894_v7, %v3344_v6  ;;  %v3569_v59 = vor.u32 %v3950_v53, %v3568_v8  ;;  %v3690_v6 = vld [vmem:[%s5817_s11 + $0x334] sm:$0xf0]  ;;  %v3465_v7 = vor.u32 %v3923_v61, %v3464_v60 }
 0x10c   : > { %v3689_v8 = vor.u32 %v3979_v1, %v3688_v62  ;;  %v3916_v53 = vld [vmem:[%s5817_s11 + $0x138] sm:$0xf0]  ;;  %v3885_v62 = vld [vmem:[%s5817_s11 + $0x44] sm:$0xf] }
 0x10d   : > { %v3944_v61 = vld [vmem:[%s5817_s11 + $0x218] sm:$0xf0] }
 0x10e   : > { %v1310_v14 = vpop.f32.mrf.mxu0 }
 0x10f   : > { %v1311_v15 = vadd.f32 %v1310_v14, %v1297_v13  ;;  %v3982_v13 = vld [vmem:[%s5817_s11 + $0x34c] sm:$0xf]  ;;  %v3710_v14 = vld [vmem:[%s5817_s11 + $0x364] sm:$0xf0] }
 0x111   : > { %v1316_v17 = vmax.f32 %v1311_v15, 0.0  ;;  %v3456_v15 = vld [vmem:[%s5817_s11 + $0x150] sm:$0xf] }
 0x113   : > { %v1318_v18 = vpack.c.bf16 %v1316_v17, %v1314_v16  ;;  %v3713_v16 = vor.u32 %v3982_v13, %v3710_v14  ;;  %v3922_v17 = vld [vmem:[%s5817_s11 + $0x168] sm:$0xf0]  ;;  %v3316_v13 = vld [vmem:[%s5817_s11 + $0x38] sm:$0xf]  ;;  %v3887_v14 = vld [vmem:[%s5817_s11 + $0x50] sm:$0xf0] }
 0x114   : > { %v3457_v20 = vor.u32 %v3922_v17, %v3456_v15  ;;  %v3540_v15 = vld [vmem:[%s5817_s11 + $0x1f8] sm:$0xf]  ;;  %v3943_v17 = vld [vmem:[%s5817_s11 + $0x210] sm:$0xf0] }
 0x115   : > { %1473 = vmatmul.bf16.vlgmr.msrb.gmra.mxu3 %v1318_v18  ;;  %v3680_v18 = vld [vmem:[%s5817_s11 + $0x310] sm:$0xf]  ;;  %2424 = vmatpush.bf16.msrb.mxu1 %v3713_v16  ;;  %v3573_v16 = vor.u32 %v3947_v37, %v3570_v44  ;;  %v3972_v37 = vld [vmem:[%s5817_s11 + $0x2f8] sm:$0xf0]  ;;  %v3913_v44 = vld [vmem:[%s5817_s11 + $0x124] sm:$0xf] }
 0x116   : > { %v3681_v21 = vor.u32 %v3978_v19, %v3680_v18  ;;  %2383 = vmatpush.bf16.msrb.mxu2 %v3457_v20  ;;  %v3884_v18 = vld [vmem:[%s5817_s11 + $0x3c] sm:$0xf]  ;;  %v3318_v19 = vld [vmem:[%s5817_s11 + $0x54] sm:$0xf0] }
 0x117   : > { %v3940_v20 = vld [vmem:[%s5817_s11 + $0x1fc] sm:$0xf] }
 0x118   : > { %2397 = vmatpush.bf16.msra.mxu3 %v3681_v21  ;;  %v3542_v21 = vld [vmem:[%s5817_s11 + $0x214] sm:$0xf0] }
 0x167   : > { %v1460_v23 = vpop.f32.mrf.mxu1 }
 0x168   : > { %v1461_v27 = vadd.f32 %v4032_v25, %v1460_v23  ;;  %v3458_v23 = vld [vmem:[%s5817_s11 + $0x16c] sm:$0xf0] }
 0x16f   : > { %v1462_v26 = vpop.f32.mrf.mxu1 }
 0x170   : > { %v1463_v28 = vadd.f32 %v4032_v25, %v1462_v26  ;;  %v3461_v25 = vor.u32 %v3919_v22, %v3458_v23  ;;  %v3682_v26 = vld [vmem:[%s5817_s11 + $0x32c] sm:$0xf0]  ;;  %v3317_v22 = vor.u32 %v3887_v14, %v3316_v13 }
 0x198   : > { %v1474_v24 = vpop.f32.mrf.mxu3 }
 0x199   : > { %v1475_v29 = vadd.f32 %v1474_v24, %v1461_v27  ;;  %v3975_v24 = vld [vmem:[%s5817_s11 + $0x314] sm:$0xf]  ;;  %v3428_v27 = vld [vmem:[%s5817_s11 + $0x118] sm:$0xf] }
 0x19b   : > { %v1479_v32 = vmax.f32 %v1475_v29, 0.0  ;;  %v3685_v29 = vor.u32 %v3975_v24, %v3682_v26  ;;  %v3541_v24 = vor.u32 %v3943_v17, %v3540_v15  ;;  %v3288_v26 = vld [vmem:[%s5817_s11] sm:$0xf]  ;;  %v3408_v15 = vld [vmem:[%s5817_s11 + $0xe8] sm:$0xf] }
 0x19c   : > { %v3632_v17 = vld [vmem:[%s5817_s11 + $0x2a8] sm:$0xf] }
 0x19d   : > { %2425 = vmatpush.bf16.msrb.mxu1 %v3685_v29 }
 0x1a0   : > { %v1476_v30 = vpop.f32.mrf.mxu3 }
 0x1a1   : > { %v1477_v31 = vadd.f32 %v1476_v30, %v1463_v28  ;;  %v3915_v28 = vld [vmem:[%s5817_s11 + $0x130] sm:$0xf0]  ;;  %v3652_v30 = vld [vmem:[%s5817_s11 + $0x2d8] sm:$0xf] }
 0x1a3   : > { %v1480_v33 = vmax.f32 %v1477_v31, 0.0  ;;  %v3971_v31 = vld [vmem:[%s5817_s11 + $0x2f0] sm:$0xf0] }
 0x1a5   : > { %v1481_v34 = vpack.c.bf16 %v1480_v33, %v1479_v32  ;;  %v3912_v32 = vld [vmem:[%s5817_s11 + $0x11c] sm:$0xf]  ;;  %v3429_v33 = vor.u32 %v3915_v28, %v3428_v27  ;;  %v3512_v28 = vld [vmem:[%s5817_s11 + $0x1c0] sm:$0xf] }
 0x1a6   : > { %v3880_v27 = vld [vmem:[%s5817_s11 + $0x18] sm:$0xf0] }
 0x1a7   : > { %3246 = vmatmul.msk.bf16.vlgmr.msra.gmra.mxu0 %vm1518_vm1, %v1481_v34  ;;  %v3430_v34 = vld [vmem:[%s5817_s11 + $0x134] sm:$0xf0]  ;;  %2384 = vmatpush.bf16.msrb.mxu2 %v3429_v33  ;;  %v3290_v33 = vld [vmem:[%s5817_s11 + $0x1c] sm:$0xf0] }
 0x1a8   : > { %2410 = vmatpush.bf16.msra.mxu0 %v3489_v12  ;;  %v3349_v12 = vor.u32 %v3891_v63, %v3346_v48  ;;  %v3660_v63 = vld [vmem:[%s5817_s11 + $0x2e0] sm:$0xf] }
 0x1a9   : > { %v3661_v13 = vor.u32 %v3972_v37, %v3660_v63  ;;  %v3878_v63 = vld [vmem:[%s5817_s11 + $0xc] sm:$0xf] }
 0x1ac   : > { %2411 = vmatpush.bf16.msra.mxu0 %v3461_v25  ;;  %v3321_v25 = vor.u32 %v3884_v18, %v3318_v19  ;;  %v3965_v19 = vld [vmem:[%s5817_s11 + $0x2c0] sm:$0xf0] }
 0x224   : > { %v1531_v36 = vpop.f32.mrf.mxu0 }
 0x225   : > { %v1532_v39 = vadd.f32 %v4033_v38, %v1531_v36  ;;  %v3654_v36 = vld [vmem:[%s5817_s11 + $0x2f4] sm:$0xf0] }
 0x227   : > { %v1536_v42 = vmax.f32 %v1532_v39, 0.0  ;;  %v3433_v39 = vor.u32 %v3912_v32, %v3430_v34  ;;  %v3877_v32 = vld [vmem:[%s5817_s11 + $0x4] sm:$0xf] }
 0x228   : > { %v3293_v50 = vor.u32 %v3877_v32, %v3290_v33  ;;  %v3958_v32 = vld [vmem:[%s5817_s11 + $0x288] sm:$0xf0]  ;;  %v3899_v33 = vld [vmem:[%s5817_s11 + $0xb4] sm:$0xf] }
 0x229   : > { %2412 = vmatpush.bf16.msra.mxu0 %v3433_v39  ;;  %v3289_v39 = vor.u32 %v3880_v27, %v3288_v26 }
 0x22c   : > { %v1533_v40 = vpop.f32.mrf.mxu0 }
 0x22d   : > { %v1534_v41 = vadd.f32 %v4033_v38, %v1533_v40  ;;  %v3653_v38 = vor.u32 %v3971_v31, %v3652_v30  ;;  %v3400_v40 = vld [vmem:[%s5817_s11 + $0xe0] sm:$0xf]  ;;  %2413 = vmatpush.bf16.msra.mxu0 %v3405_v54  ;;  %v3545_v30 = vor.u32 %v3940_v20, %v3542_v21  ;;  %v3936_v31 = vld [vmem:[%s5817_s11 + $0x1d8] sm:$0xf0]  ;;  %v3906_v20 = vld [vmem:[%s5817_s11 + $0xec] sm:$0xf] }
 0x22e   : > { %v3513_v49 = vor.u32 %v3936_v31, %v3512_v28  ;;  %v3410_v21 = vld [vmem:[%s5817_s11 + $0x104] sm:$0xf0]  ;;  %v3380_v28 = vld [vmem:[%s5817_s11 + $0xb0] sm:$0xf] }
 0x22f   : > { %v1537_v43 = vmax.f32 %v1534_v41, 0.0  ;;  %v3908_v41 = vld [vmem:[%s5817_s11 + $0xf8] sm:$0xf0]  ;;  %2398 = vmatpush.bf16.msra.mxu3 %v3653_v38  ;;  %v3492_v38 = vld [vmem:[%s5817_s11 + $0x190] sm:$0xf]  ;;  %v3413_v26 = vor.u32 %v3906_v20, %v3410_v21 }
 0x230   : > { %v3401_v51 = vor.u32 %v3908_v41, %v3400_v40  ;;  %v3930_v40 = vld [vmem:[%s5817_s11 + $0x1a8] sm:$0xf0]  ;;  %v3716_v41 = vld [vmem:[%s5817_s11 + $0x350] sm:$0xf]  ;;  %v3500_v21 = vld [vmem:[%s5817_s11 + $0x198] sm:$0xf] }
 0x231   : > { %v1538_v45 = vpack.c.bf16 %v1537_v43, %v1536_v42  ;;  %v3624_v42 = vld [vmem:[%s5817_s11 + $0x2a0] sm:$0xf]  ;;  %v3657_v43 = vor.u32 %v3968_v35, %v3654_v36  ;;  %2414 = vmatpush.bf16.msra.mxu0 %v3377_v5  ;;  %v3933_v35 = vld [vmem:[%s5817_s11 + $0x1c4] sm:$0xf]  ;;  %v3493_v56 = vor.u32 %v3930_v40, %v3492_v38  ;;  %v3976_v5 = vld [vmem:[%s5817_s11 + $0x31c] sm:$0xf] }
 0x232   : > { %2385 = vmatpush.bf16.msrb.mxu2 %v3401_v51  ;;  %v3514_v36 = vld [vmem:[%s5817_s11 + $0x1dc] sm:$0xf0]  ;;  %v3983_v51 = vld [vmem:[%s5817_s11 + $0x354] sm:$0xf]  ;;  %v3693_v48 = vor.u32 %v3976_v5, %v3690_v6  ;;  %v3604_v31 = vld [vmem:[%s5817_s11 + $0x270] sm:$0xf] }
 0x233   : > { %3251 = vmatmul.msk.bf16.vlgmr.msra.gmra.mxu2 %vm1113_vm0, %v1538_v45  ;;  %v3964_v45 = vld [vmem:[%s5817_s11 + $0x2b8] sm:$0xf0]  ;;  %2426 = vmatpush.bf16.msrb.mxu1 %v3657_v43  ;;  %v3517_v55 = vor.u32 %v3933_v35, %v3514_v36  ;;  %v3382_v35 = vld [vmem:[%s5817_s11 + $0xcc] sm:$0xf0]  ;;  %v3955_v36 = vld [vmem:[%s5817_s11 + $0x274] sm:$0xf] }
 0x234   : > { %v3625_v52 = vor.u32 %v3964_v45, %v3624_v42  ;;  %v3986_v42 = vld [vmem:[%s5817_s11 + $0x368] sm:$0xf0]  ;;  %v3606_v38 = vld [vmem:[%s5817_s11 + $0x28c] sm:$0xf0]  ;;  %v3550_v5 = vld [vmem:[%s5817_s11 + $0x21c] sm:$0xf0] }
 0x235   : > { %2415 = vmatpush.bf16.msra.mxu0 %v3349_v12  ;;  %v3717_v57 = vor.u32 %v3986_v42, %v3716_v41  ;;  %v3609_v40 = vor.u32 %v3955_v36, %v3606_v38  ;;  %v3352_v41 = vld [vmem:[%s5817_s11 + $0x78] sm:$0xf]  ;;  %v3895_v42 = vld [vmem:[%s5817_s11 + $0x90] sm:$0xf0] }
 0x236   : > { %2399 = vmatpush.bf16.msra.mxu3 %v3625_v52  ;;  %2386 = vmatpush.bf16.msrb.mxu2 %v3373_v2  ;;  %v3718_v52 = vld [vmem:[%s5817_s11 + $0x36c] sm:$0xf0]  ;;  %v3920_v2 = vld [vmem:[%s5817_s11 + $0x15c] sm:$0xf] }
 0x237   : > { %2427 = vmatpush.bf16.msrb.mxu1 %v3629_v58  ;;  %v3497_v58 = vor.u32 %v3927_v46, %v3494_v47  ;;  %v3721_v0 = vor.u32 %v3983_v51, %v3718_v52  ;;  %v3951_v46 = vld [vmem:[%s5817_s11 + $0x250] sm:$0xf0]  ;;  %v3892_v47 = vld [vmem:[%s5817_s11 + $0x7c] sm:$0xf] }
 0x238   : > { %v3948_v52 = vld [vmem:[%s5817_s11 + $0x23c] sm:$0xf] }
 0x239   : > { %2416 = vmatpush.bf16.msra.mxu0 %v3321_v25  ;;  %v3633_v25 = vor.u32 %v3965_v19, %v3632_v17 }
 0x23a   : > { %2400 = vmatpush.bf16.msra.mxu3 %v3597_v3  ;;  %2387 = vmatpush.bf16.msrb.mxu2 %v3345_v11  ;;  %v3466_v3 = vld [vmem:[%s5817_s11 + $0x174] sm:$0xf0]  ;;  %v3969_v11 = vld [vmem:[%s5817_s11 + $0x2e4] sm:$0xf] }
 0x23b   : > { %2428 = vmatpush.bf16.msrb.mxu1 %v3601_v4  ;;  %v3436_v4 = vld [vmem:[%s5817_s11 + $0x120] sm:$0xf] }
 0x23c   : > { %v3437_v12 = vor.u32 %v3916_v53, %v3436_v4  ;;  %v3937_v53 = vld [vmem:[%s5817_s11 + $0x1e0] sm:$0xf0] }
 0x23d   : > { %2417 = vmatpush.bf16.msra.mxu0 %v3293_v50 }
 0x23e   : > { %2401 = vmatpush.bf16.msra.mxu3 %v3569_v59  ;;  %2388 = vmatpush.bf16.msrb.mxu2 %v3317_v22  ;;  %v3662_v59 = vld [vmem:[%s5817_s11 + $0x2fc] sm:$0xf0]  ;;  %v3962_v22 = vld [vmem:[%s5817_s11 + $0x2ac] sm:$0xf] }
 0x23f   : > { %2429 = vmatpush.bf16.msrb.mxu1 %v3573_v16  ;;  %v3909_v16 = vld [vmem:[%s5817_s11 + $0x100] sm:$0xf0]  ;;  %v3665_v18 = vor.u32 %v3969_v11, %v3662_v59  ;;  %v3522_v11 = vld [vmem:[%s5817_s11 + $0x1e4] sm:$0xf0] }
 0x242   : > { %2402 = vmatpush.bf16.msra.mxu3 %v3541_v24  ;;  %2389 = vmatpush.bf16.msrb.mxu2 %v3289_v39  ;;  %v3409_v24 = vor.u32 %v3909_v16, %v3408_v15  ;;  %v3385_v39 = vor.u32 %v3899_v33, %v3382_v35 }
 0x243   : > { %2430 = vmatpush.bf16.msrb.mxu1 %v3545_v30 }
 0x246   : > { %2403 = vmatpush.bf16.msra.mxu3 %v3513_v49  ;;  %2438 = vmatpush.bf16.msra.mxu2 %v3493_v56  ;;  %v3354_v49 = vld [vmem:[%s5817_s11 + $0x94] sm:$0xf0]  ;;  %v3324_v56 = vld [vmem:[%s5817_s11 + $0x40] sm:$0xf] }
 0x247   : > { %2431 = vmatpush.bf16.msrb.mxu1 %v3517_v55  ;;  %v3357_v51 = vor.u32 %v3892_v47, %v3354_v49  ;;  %v3921_v47 = vld [vmem:[%s5817_s11 + $0x164] sm:$0xf]  ;;  %v3474_v49 = vld [vmem:[%s5817_s11 + $0x17c] sm:$0xf0] }
 0x24a   : > { %2452 = vmatpush.bf16.msrb.mxu3 %v3717_v57  ;;  %2439 = vmatpush.bf16.msra.mxu2 %v3465_v7  ;;  %v3888_v57 = vld [vmem:[%s5817_s11 + $0x58] sm:$0xf0]  ;;  %v3296_v7 = vld [vmem:[%s5817_s11 + $0x8] sm:$0xf] }
 0x24b   : > { %v3325_v60 = vor.u32 %v3888_v57, %v3324_v56  ;;  %v3917_v56 = vld [vmem:[%s5817_s11 + $0x140] sm:$0xf0]  ;;  %v3477_v57 = vor.u32 %v3921_v47, %v3474_v49  ;;  %v3942_v47 = vld [vmem:[%s5817_s11 + $0x20c] sm:$0xf]  ;;  %v3558_v49 = vld [vmem:[%s5817_s11 + $0x224] sm:$0xf0] }
 0x24e   : > { %2453 = vmatpush.bf16.msrb.mxu3 %v3689_v8  ;;  %2440 = vmatpush.bf16.msra.mxu2 %v3437_v12  ;;  %v3881_v8 = vld [vmem:[%s5817_s11 + $0x20] sm:$0xf0]  ;;  %v1579_v12 = vld [vmem:[%s5816_s10] sm:$0x3] }
 0x24f   : > { %v3297_v4 = vor.u32 %v3881_v8, %v3296_v7  ;;  %v1581_v15 = vperm.slane %v1579_v12, 0  ;;  %v1582_v16 = vperm.slane %v1579_v12, 1  ;;  %v3910_v7 = vld [vmem:[%s5817_s11 + $0x108] sm:$0xf0]  ;;  %v3903_v12 = vld [vmem:[%s5817_s11 + $0xd0] sm:$0xf0] }
 0x252   : > { %2454 = vmatpush.bf16.msrb.mxu3 %v3661_v13  ;;  %2441 = vmatpush.bf16.msra.mxu2 %v3409_v24  ;;  %v3931_v24 = vld [vmem:[%s5817_s11 + $0x1b0] sm:$0xf0] }
 0x253   : > { %v3501_v38 = vor.u32 %v3931_v24, %v3500_v21  ;;  %v3896_v24 = vld [vmem:[%s5817_s11 + $0x98] sm:$0xf0] }
 0x256   : > { %2455 = vmatpush.bf16.msrb.mxu3 %v3633_v25  ;;  %v3724_v25 = vld [vmem:[%s5817_s11 + $0x358] sm:$0xf] }
 0x2b6   : > { %v1563_v9 = vpop.f32.mrf.mxu2 }
 0x2b7   : > { %v1564_v23 = vadd.f32 %v4034_v10, %v1563_v9  ;;  %v3469_v9 = vor.u32 %v3920_v2, %v3466_v3  ;;  %v3941_v3 = vld [vmem:[%s5817_s11 + $0x204] sm:$0xf] }
 0x2b8   : > { %v3553_v6 = vor.u32 %v3941_v3, %v3550_v5 }
 0x2b9   : > { %v1568_v43 = vmax.f32 %v1564_v23, 0.0  ;;  %v3634_v23 = vld [vmem:[%s5817_s11 + $0x2c4] sm:$0xf0] }
 0x2ba   : > { %v3637_v27 = vor.u32 %v3962_v22, %v3634_v23 }
 0x2be   : > { %v1565_v29 = vpop.f32.mrf.mxu2 }
 0x2bf   : > { %v1566_v34 = vadd.f32 %v4034_v10, %v1565_v29  ;;  %v3438_v10 = vld [vmem:[%s5817_s11 + $0x13c] sm:$0xf0]  ;;  %v3902_v29 = vld [vmem:[%s5817_s11 + $0xc8] sm:$0xf0] }
 0x2c0   : > { %v3441_v14 = vor.u32 %v3913_v44, %v3438_v10  ;;  %v3381_v30 = vor.u32 %v3902_v29, %v3380_v28  ;;  %v3934_v10 = vld [vmem:[%s5817_s11 + $0x1cc] sm:$0xf]  ;;  %v3502_v28 = vld [vmem:[%s5817_s11 + $0x1b4] sm:$0xf0]  ;;  %v3984_v29 = vld [vmem:[%s5817_s11 + $0x35c] sm:$0xf] }
 0x2c1   : > { %v1569_v45 = vmax.f32 %v1566_v34, 0.0  ;;  %v3605_v34 = vor.u32 %v3958_v32, %v3604_v31  ;;  %v3525_v59 = vor.u32 %v3934_v10, %v3522_v11 }
 0x2c2   : > { %2442 = vmatpush.bf16.msra.mxu2 %v3381_v30 }
 0x2c3   : > { %v1570_v54 = vpack.c.bf16 %v1569_v45, %v1568_v43  ;;  %v3576_v43 = vld [vmem:[%s5817_s11 + $0x238] sm:$0xf]  ;;  %2456 = vmatpush.bf16.msrb.mxu3 %v3605_v34  ;;  %v3353_v45 = vor.u32 %v3895_v42, %v3352_v41  ;;  %v3924_v41 = vld [vmem:[%s5817_s11 + $0x178] sm:$0xf0] }
 0x2c4   : > { %v3577_v50 = vor.u32 %v3951_v46, %v3576_v43  ;;  %v3726_v34 = vld [vmem:[%s5817_s11 + $0x374] sm:$0xf0]  ;;  %v3980_v46 = vld [vmem:[%s5817_s11 + $0x338] sm:$0xf0] }
 0x2c5   : > { %3284 = vmatmul.msk.bf16.vlgmr.msrb.gmra.mxu0 %vm1518_vm1, %v1570_v54  ;;  %3285 = vmatmul.msk.bf16.vlgmr.msra.gmra.mxu1 %vm1518_vm1, %v1570_v54  ;;  %v3578_v54 = vld [vmem:[%s5817_s11 + $0x254] sm:$0xf0]  ;;  %v3729_v43 = vor.u32 %v3984_v29, %v3726_v34  ;;  %v3893_v29 = vld [vmem:[%s5817_s11 + $0x84] sm:$0xf] }
 0x2c6   : > { %2466 = vmatpush.bf16.msrb.mxu0 %v3497_v58  ;;  %2480 = vmatpush.bf16.msra.mxu1 %v3721_v0  ;;  %v3581_v55 = vor.u32 %v3948_v52, %v3578_v54  ;;  %v3548_v58 = vld [vmem:[%s5817_s11 + $0x200] sm:$0xf] }
 0x2c7   : > { %2443 = vmatpush.bf16.msra.mxu2 %v3353_v45  ;;  %2457 = vmatpush.bf16.msrb.mxu3 %v3577_v50  ;;  %v3326_v0 = vld [vmem:[%s5817_s11 + $0x5c] sm:$0xf0]  ;;  %v3549_v1 = vor.u32 %v3944_v61, %v3548_v58  ;;  %v3977_v50 = vld [vmem:[%s5817_s11 + $0x324] sm:$0xf] }
 0x2c8   : > { %v3329_v2 = vor.u32 %v3885_v62, %v3326_v0  ;;  %v3696_v45 = vld [vmem:[%s5817_s11 + $0x320] sm:$0xf]  ;;  %v3973_v61 = vld [vmem:[%s5817_s11 + $0x300] sm:$0xf0]  ;;  %v3914_v62 = vld [vmem:[%s5817_s11 + $0x12c] sm:$0xf] }
 0x2c9   : > { %v3697_v54 = vor.u32 %v3980_v46, %v3696_v45  ;;  %v3446_v0 = vld [vmem:[%s5817_s11 + $0x144] sm:$0xf0]  ;;  %v3886_v45 = vld [vmem:[%s5817_s11 + $0x4c] sm:$0xf] }
 0x2ca   : > { %2467 = vmatpush.bf16.msrb.mxu0 %v3469_v9  ;;  %2481 = vmatpush.bf16.msra.mxu1 %v3693_v48  ;;  %v3520_v9 = vld [vmem:[%s5817_s11 + $0x1c8] sm:$0xf]  ;;  %v3449_v8 = vor.u32 %v3914_v62, %v3446_v0  ;;  %v3935_v62 = vld [vmem:[%s5817_s11 + $0x1d4] sm:$0xf]  ;;  %v3530_v0 = vld [vmem:[%s5817_s11 + $0x1ec] sm:$0xf0] }
 0x2cb   : > { %2444 = vmatpush.bf16.msra.mxu2 %v3325_v60  ;;  %2458 = vmatpush.bf16.msrb.mxu3 %v3549_v1  ;;  %v3298_v48 = vld [vmem:[%s5817_s11 + $0x24] sm:$0xf0]  ;;  %v3521_v37 = vor.u32 %v3937_v53, %v3520_v9  ;;  %v3970_v1 = vld [vmem:[%s5817_s11 + $0x2ec] sm:$0xf] }
 0x2cc   : > { %v3301_v44 = vor.u32 %v3878_v63, %v3298_v48  ;;  %v3668_v60 = vld [vmem:[%s5817_s11 + $0x2e8] sm:$0xf]  ;;  %v3966_v53 = vld [vmem:[%s5817_s11 + $0x2c8] sm:$0xf0]  ;;  %v3907_v63 = vld [vmem:[%s5817_s11 + $0xf4] sm:$0xf] }
 0x2cd   : > { %v3669_v5 = vor.u32 %v3973_v61, %v3668_v60  ;;  %v3418_v48 = vld [vmem:[%s5817_s11 + $0x10c] sm:$0xf0]  ;;  %v3334_v46 = vld [vmem:[%s5817_s11 + $0x64] sm:$0xf0]  ;;  %v3879_v60 = vld [vmem:[%s5817_s11 + $0x14] sm:$0xf] }
 0x2ce   : > { %2468 = vmatpush.bf16.msrb.mxu0 %v3441_v14  ;;  %2482 = vmatpush.bf16.msra.mxu1 %v3665_v18  ;;  %v3306_v61 = vld [vmem:[%s5817_s11 + $0x2c] sm:$0xf0] }
 0x2cf   : > { %2445 = vmatpush.bf16.msra.mxu2 %v3297_v4  ;;  %2459 = vmatpush.bf16.msrb.mxu3 %v3521_v37  ;;  %v3640_v4 = vld [vmem:[%s5817_s11 + $0x2b0] sm:$0xf]  ;;  %v3963_v37 = vld [vmem:[%s5817_s11 + $0x2b4] sm:$0xf] }
 0x2d0   : > { %v3641_v11 = vor.u32 %v3966_v53, %v3640_v4 }
 0x2d2   : > { %2469 = vmatpush.bf16.msrb.mxu0 %v3413_v26  ;;  %2483 = vmatpush.bf16.msra.mxu1 %v3637_v27  ;;  %v3987_v26 = vld [vmem:[%s5817_s11 + $0x370] sm:$0xf0]  ;;  %v3928_v27 = vld [vmem:[%s5817_s11 + $0x19c] sm:$0xf] }
 0x2d3   : > { %v3505_v42 = vor.u32 %v3928_v27, %v3502_v28  ;;  %v3584_v27 = vld [vmem:[%s5817_s11 + $0x240] sm:$0xf]  ;;  %v3952_v28 = vld [vmem:[%s5817_s11 + $0x258] sm:$0xf0] }
 0x2d4   : > { %v3585_v34 = vor.u32 %v3952_v28, %v3584_v27 }
 0x2d6   : > { %2470 = vmatpush.bf16.msrb.mxu0 %v3385_v39  ;;  %2484 = vmatpush.bf16.msra.mxu1 %v3609_v40  ;;  %v3725_v39 = vor.u32 %v3987_v26, %v3724_v25  ;;  %v3472_v40 = vld [vmem:[%s5817_s11 + $0x160] sm:$0xf] }
 0x2d7   : > { %v3473_v52 = vor.u32 %v3924_v41, %v3472_v40 }
 0x2da   : > { %2471 = vmatpush.bf16.msrb.mxu0 %v3357_v51  ;;  %2485 = vmatpush.bf16.msra.mxu1 %v3581_v55  ;;  %v3698_v51 = vld [vmem:[%s5817_s11 + $0x33c] sm:$0xf0]  ;;  %v3444_v55 = vld [vmem:[%s5817_s11 + $0x128] sm:$0xf] }
 0x2db   : > { %v3701_v58 = vor.u32 %v3977_v50, %v3698_v51  ;;  %v3445_v3 = vor.u32 %v3917_v56, %v3444_v55  ;;  %v3304_v50 = vld [vmem:[%s5817_s11 + $0x10] sm:$0xf]  ;;  %v3882_v51 = vld [vmem:[%s5817_s11 + $0x28] sm:$0xf0] }
 0x2dc   : > { %v3528_v55 = vld [vmem:[%s5817_s11 + $0x1d0] sm:$0xf]  ;;  %v3938_v56 = vld [vmem:[%s5817_s11 + $0x1e8] sm:$0xf0] }
 0x2de   : > { %2472 = vmatpush.bf16.msrb.mxu0 %v3329_v2  ;;  %2486 = vmatpush.bf16.msra.mxu1 %v3553_v6  ;;  %v3670_v2 = vld [vmem:[%s5817_s11 + $0x304] sm:$0xf0]  ;;  %v3416_v6 = vld [vmem:[%s5817_s11 + $0xf0] sm:$0xf] }
 0x2df   : > { %v3673_v9 = vor.u32 %v3970_v1, %v3670_v2  ;;  %v3417_v10 = vor.u32 %v3910_v7, %v3416_v6  ;;  %v3508_v1 = vld [vmem:[%s5817_s11 + $0x1a0] sm:$0xf]  ;;  %v3932_v2 = vld [vmem:[%s5817_s11 + $0x1b8] sm:$0xf0]  ;;  %v3305_v6 = vor.u32 %v3882_v51, %v3304_v50  ;;  %v3529_v7 = vor.u32 %v3938_v56, %v3528_v55 }
 0x2e0   : > { %v3509_v4 = vor.u32 %v3932_v2, %v3508_v1 }
 0x2e2   : > { %2473 = vmatpush.bf16.msrb.mxu0 %v3301_v44  ;;  %2487 = vmatpush.bf16.msra.mxu1 %v3525_v59  ;;  %v3642_v44 = vld [vmem:[%s5817_s11 + $0x2cc] sm:$0xf0]  ;;  %v3388_v59 = vld [vmem:[%s5817_s11 + $0xb8] sm:$0xf] }
 0x2e3   : > { %v3389_v21 = vor.u32 %v3903_v12, %v3388_v59  ;;  %v3452_v59 = vld [vmem:[%s5817_s11 + $0x130] sm:$0xf]  ;;  %v3918_v12 = vld [vmem:[%s5817_s11 + $0x148] sm:$0xf0] }
 0x342   : > { %v1637_v13 = vpop.f32.mrf.mxu0  ;;  %v1651_v14 = vpop.f32.mrf.mxu1 }
 0x343   : > { %v1638_v17 = vadd.f32 %v1637_v13, %v1581_v15  ;;  %v1652_v18 = vadd.f32 %v1651_v14, %v1582_v16  ;;  %v3421_v13 = vor.u32 %v3907_v63, %v3418_v48  ;;  %v3645_v14 = vor.u32 %v3963_v37, %v3642_v44  ;;  %v3480_v63 = vld [vmem:[%s5817_s11 + $0x168] sm:$0xf]  ;;  %v3925_v48 = vld [vmem:[%s5817_s11 + $0x180] sm:$0xf0] }
 0x344   : > { %v3704_v37 = vld [vmem:[%s5817_s11 + $0x328] sm:$0xf]  ;;  %v3981_v44 = vld [vmem:[%s5817_s11 + $0x340] sm:$0xf0] }
 0x345   : > { %v1656_v30 = vmax.f32 %v1638_v17, 0.0  ;;  %v1657_v31 = vmax.f32 %v1652_v18, 0.0  ;;  %v3900_v17 = vld [vmem:[%s5817_s11 + $0xbc] sm:$0xf]  ;;  %v3390_v18 = vld [vmem:[%s5817_s11 + $0xd4] sm:$0xf0] }
 0x346   : > { %v3393_v25 = vor.u32 %v3900_v17, %v3390_v18  ;;  %v3424_v17 = vld [vmem:[%s5817_s11 + $0xf8] sm:$0xf]  ;;  %v3911_v18 = vld [vmem:[%s5817_s11 + $0x110] sm:$0xf0] }
 0x34a   : > { %v1639_v19 = vpop.f32.mrf.mxu0  ;;  %v1653_v20 = vpop.f32.mrf.mxu1 }
 0x34b   : > { %v1640_v22 = vadd.f32 %v1639_v19, %v1581_v15  ;;  %v1654_v23 = vadd.f32 %v1653_v20, %v1582_v16  ;;  %v3612_v15 = vld [vmem:[%s5817_s11 + $0x278] sm:$0xf]  ;;  %v3959_v16 = vld [vmem:[%s5817_s11 + $0x290] sm:$0xf0]  ;;  %v3956_v19 = vld [vmem:[%s5817_s11 + $0x27c] sm:$0xf] }
 0x34c   : > { %v3614_v20 = vld [vmem:[%s5817_s11 + $0x294] sm:$0xf0] }
 0x34d   : > { %v1658_v32 = vmax.f32 %v1640_v22, 0.0  ;;  %v1659_v33 = vmax.f32 %v1654_v23, 0.0  ;;  %v3613_v22 = vor.u32 %v3959_v16, %v3612_v15  ;;  %v3360_v23 = vld [vmem:[%s5817_s11 + $0x80] sm:$0xf]  ;;  %v3617_v26 = vor.u32 %v3956_v19, %v3614_v20  ;;  %v3648_v19 = vld [vmem:[%s5817_s11 + $0x2b8] sm:$0xf] }
 0x34e   : > { %v3453_v15 = vor.u32 %v3918_v12, %v3452_v59  ;;  %v3967_v20 = vld [vmem:[%s5817_s11 + $0x2d0] sm:$0xf0] }
 0x34f   : > { %v5439_v35 = vpack.c.bf16 %v1658_v32, %v1656_v30  ;;  %v5441_v36 = vpack.c.bf16 %v1659_v33, %v1657_v31  ;;  %v3362_v30 = vld [vmem:[%s5817_s11 + $0x9c] sm:$0xf0]  ;;  %v3949_v31 = vld [vmem:[%s5817_s11 + $0x244] sm:$0xf]  ;;  %v3361_v33 = vor.u32 %v3896_v24, %v3360_v23  ;;  %v3904_v24 = vld [vmem:[%s5817_s11 + $0xd8] sm:$0xf0] }
 0x350   : > { %v3586_v32 = vld [vmem:[%s5817_s11 + $0x25c] sm:$0xf0]  ;;  %v3365_v40 = vor.u32 %v3893_v29, %v3362_v30  ;;  %v3368_v29 = vld [vmem:[%s5817_s11 + $0x88] sm:$0xf]  ;;  %v3897_v30 = vld [vmem:[%s5817_s11 + $0xa0] sm:$0xf0] }
 0x351   : > { %2390 = vmatmul.bf16.vlgmr.msrb.gmra.mxu2 %v5439_v35  ;;  %2404 = vmatmul.bf16.vlgmr.msra.gmra.mxu3 %v5441_v36  ;;  %v3589_v41 = vor.u32 %v3949_v31, %v3586_v32  ;;  %v3396_v23 = vld [vmem:[%s5817_s11 + $0xc0] sm:$0xf]  ;;  %v3592_v31 = vld [vmem:[%s5817_s11 + $0x248] sm:$0xf]  ;;  %v3953_v32 = vld [vmem:[%s5817_s11 + $0x260] sm:$0xf0] }
 0x352   : > { %2418 = vmatmul.bf16.vlgmr.msra.gmra.mxu0 %v5439_v35  ;;  %2432 = vmatmul.bf16.vlgmr.msrb.gmra.mxu1 %v5441_v36  ;;  %v3397_v27 = vor.u32 %v3904_v24, %v3396_v23 }
 0x353   : > { %2494 = vmatpush.bf16.msrb.mxu2 %v3501_v38  ;;  %2508 = vmatpush.bf16.msra.mxu3 %v3725_v39  ;;  %v3332_v38 = vld [vmem:[%s5817_s11 + $0x48] sm:$0xf]  ;;  %v3889_v39 = vld [vmem:[%s5817_s11 + $0x60] sm:$0xf0] }
 0x354   : > { %2522 = vmatpush.bf16.msra.mxu0 %v3505_v42  ;;  %2536 = vmatpush.bf16.msrb.mxu1 %v3729_v43  ;;  %v3556_v42 = vld [vmem:[%s5817_s11 + $0x208] sm:$0xf]  ;;  %v3945_v43 = vld [vmem:[%s5817_s11 + $0x220] sm:$0xf0] }
 0x357   : > { %2495 = vmatpush.bf16.msrb.mxu2 %v3473_v52  ;;  %2509 = vmatpush.bf16.msra.mxu3 %v3697_v54  ;;  %v3333_v52 = vor.u32 %v3889_v39, %v3332_v38  ;;  %v3557_v54 = vor.u32 %v3945_v43, %v3556_v42  ;;  %v3340_v38 = vld [vmem:[%s5817_s11 + $0x50] sm:$0xf]  ;;  %v3890_v39 = vld [vmem:[%s5817_s11 + $0x68] sm:$0xf0] }
 0x358   : > { %2523 = vmatpush.bf16.msra.mxu0 %v3477_v57  ;;  %2537 = vmatpush.bf16.msrb.mxu1 %v3701_v58  ;;  %v3337_v57 = vor.u32 %v3886_v45, %v3334_v46  ;;  %v3561_v58 = vor.u32 %v3942_v47, %v3558_v49  ;;  %v3341_v42 = vor.u32 %v3890_v39, %v3340_v38  ;;  %v3312_v45 = vld [vmem:[%s5817_s11 + $0x18] sm:$0xf]  ;;  %v3883_v46 = vld [vmem:[%s5817_s11 + $0x30] sm:$0xf0] }
 0x359   : > { %v3536_v47 = vld [vmem:[%s5817_s11 + $0x1d8] sm:$0xf]  ;;  %v3939_v49 = vld [vmem:[%s5817_s11 + $0x1f0] sm:$0xf0]  ;;  %v3313_v50 = vor.u32 %v3883_v46, %v3312_v45 }
 0x35a   : > { %v3537_v51 = vor.u32 %v3939_v49, %v3536_v47 }
 0x35b   : > { %2496 = vmatpush.bf16.msrb.mxu2 %v3445_v3  ;;  %2510 = vmatpush.bf16.msra.mxu3 %v3669_v5  ;;  %v3732_v3 = vld [vmem:[%s5817_s11 + $0x360] sm:$0xf]  ;;  %v3988_v5 = vld [vmem:[%s5817_s11 + $0x378] sm:$0xf0] }
 0x35c   : > { %2524 = vmatpush.bf16.msra.mxu0 %v3449_v8  ;;  %2538 = vmatpush.bf16.msrb.mxu1 %v3673_v9  ;;  %v3309_v8 = vor.u32 %v3879_v60, %v3306_v61  ;;  %v3533_v9 = vor.u32 %v3935_v62, %v3530_v0  ;;  %v3733_v53 = vor.u32 %v3988_v5, %v3732_v3 }
 0x35f   : > { %2497 = vmatpush.bf16.msrb.mxu2 %v3417_v10  ;;  %2511 = vmatpush.bf16.msra.mxu3 %v3641_v11  ;;  %v3481_v10 = vor.u32 %v3925_v48, %v3480_v63  ;;  %v3705_v11 = vor.u32 %v3981_v44, %v3704_v37 }
 0x360   : > { %2525 = vmatpush.bf16.msra.mxu0 %v3421_v13  ;;  %2539 = vmatpush.bf16.msrb.mxu1 %v3645_v14  ;;  %v3676_v13 = vld [vmem:[%s5817_s11 + $0x2f0] sm:$0xf]  ;;  %v3974_v14 = vld [vmem:[%s5817_s11 + $0x308] sm:$0xf0] }
 0x361   : > { %2446 = vmatmul.bf16.vlgmr.msra.gmra.mxu2 %v5439_v35  ;;  %2460 = vmatmul.bf16.vlgmr.msrb.gmra.mxu3 %v5441_v36  ;;  %v3677_v16 = vor.u32 %v3974_v14, %v3676_v13 }
 0x362   : > { %2474 = vmatmul.bf16.vlgmr.msrb.gmra.mxu0 %v5439_v35  ;;  %2488 = vmatmul.bf16.vlgmr.msra.gmra.mxu1 %v5441_v36 }
 0x363   : > { %2498 = vmatpush.bf16.msrb.mxu2 %v3389_v21  ;;  %2512 = vmatpush.bf16.msra.mxu3 %v3613_v22  ;;  %v3425_v21 = vor.u32 %v3911_v18, %v3424_v17  ;;  %v3649_v22 = vor.u32 %v3967_v20, %v3648_v19 }
 0x364   : > { %2526 = vmatpush.bf16.msra.mxu0 %v3393_v25  ;;  %2540 = vmatpush.bf16.msrb.mxu1 %v3617_v26  ;;  %v3620_v25 = vld [vmem:[%s5817_s11 + $0x280] sm:$0xf]  ;;  %v3960_v26 = vld [vmem:[%s5817_s11 + $0x298] sm:$0xf0] }
 0x365   : > { %v3621_v28 = vor.u32 %v3960_v26, %v3620_v25 }
 0x367   : > { %2499 = vmatpush.bf16.msrb.mxu2 %v3361_v33  ;;  %2513 = vmatpush.bf16.msra.mxu3 %v3585_v34  ;;  %v3369_v33 = vor.u32 %v3897_v30, %v3368_v29  ;;  %v3593_v34 = vor.u32 %v3953_v32, %v3592_v31 }
 0x368   : > { %2527 = vmatpush.bf16.msra.mxu0 %v3365_v40  ;;  %2541 = vmatpush.bf16.msrb.mxu1 %v3589_v41  ;;  %v3564_v40 = vld [vmem:[%s5817_s11 + $0x210] sm:$0xf]  ;;  %v3946_v41 = vld [vmem:[%s5817_s11 + $0x228] sm:$0xf0] }
 0x369   : > { %v3565_v43 = vor.u32 %v3946_v41, %v3564_v40 }
 0x36b   : > { %2500 = vmatpush.bf16.msrb.mxu2 %v3333_v52  ;;  %2514 = vmatpush.bf16.msra.mxu3 %v3557_v54  ;;  %v5725_v52 = vld [vmem:[%s5818_s12] sm:$0x7f] }
 0x36c   : > { %2528 = vmatpush.bf16.msra.mxu0 %v3337_v57  ;;  %2542 = vmatpush.bf16.msrb.mxu1 %v3561_v58  ;;  %v1793_v54 = vperm.slane %v5725_v52, 1  ;;  %v1792_v58 = vperm.slane %v5725_v52, 0  ;;  %v1794_v13 = vperm.slane %v5725_v52, 2 }
 0x36f   : > { %2501 = vmatpush.bf16.msrb.mxu2 %v3305_v6  ;;  %2515 = vmatpush.bf16.msra.mxu3 %v3529_v7 }
 0x370   : > { %2529 = vmatpush.bf16.msra.mxu0 %v3309_v8  ;;  %2543 = vmatpush.bf16.msrb.mxu1 %v3533_v9 }
 0x372   : > { %2502 = vmatmul.bf16.vlgmr.msrb.gmra.mxu2 %v5439_v35  ;;  %2516 = vmatmul.bf16.vlgmr.msra.gmra.mxu3 %v5441_v36 }
 0x373   : > { %2550 = vmatpush.bf16.msra.mxu2 %v3509_v4  ;;  %2564 = vmatpush.bf16.msrb.mxu3 %v3733_v53  ;;  %v1795_v4 = vperm.slane %v5725_v52, 3 }
 0x374   : > { %2530 = vmatmul.bf16.vlgmr.msra.gmra.mxu0 %v5439_v35  ;;  %2544 = vmatmul.bf16.vlgmr.msrb.gmra.mxu1 %v5441_v36 }
 0x377   : > { %2551 = vmatpush.bf16.msra.mxu2 %v3481_v10  ;;  %2565 = vmatpush.bf16.msrb.mxu3 %v3705_v11 }
 0x37b   : > { %2552 = vmatpush.bf16.msra.mxu2 %v3453_v15  ;;  %2566 = vmatpush.bf16.msrb.mxu3 %v3677_v16 }
 0x37f   : > { %2553 = vmatpush.bf16.msra.mxu2 %v3425_v21  ;;  %2567 = vmatpush.bf16.msrb.mxu3 %v3649_v22 }
 0x383   : > { %2554 = vmatpush.bf16.msra.mxu2 %v3397_v27  ;;  %2568 = vmatpush.bf16.msrb.mxu3 %v3621_v28 }
 0x387   : > { %2555 = vmatpush.bf16.msra.mxu2 %v3369_v33  ;;  %2569 = vmatpush.bf16.msrb.mxu3 %v3593_v34 }
 0x38b   : > { %2556 = vmatpush.bf16.msra.mxu2 %v3341_v42  ;;  %2570 = vmatpush.bf16.msrb.mxu3 %v3565_v43  ;;  %v1797_v43 = vperm.slane %v5725_v52, 5 }
 0x38f   : > { %2557 = vmatpush.bf16.msra.mxu2 %v3313_v50  ;;  %2571 = vmatpush.bf16.msrb.mxu3 %v3537_v51 }
 0x392   : > { %2558 = vmatmul.bf16.vlgmr.msra.gmra.mxu2 %v5439_v35  ;;  %2572 = vmatmul.bf16.vlgmr.msrb.gmra.mxu3 %v5441_v36 }
 0x3cf   : > { %v2419_v55 = vpop.f32.mrf.mxu0  ;;  %v2433_v56 = vpop.f32.mrf.mxu1 }
 0x3d0   : > { %v2420_v57 = vadd.f32 %v2419_v55, %v1793_v54 }
 0x3d2   : > { %v2434_v60 = vadd.f32 %v2433_v56, %v2420_v57  ;;  %v1796_v57 = vperm.slane %v5725_v52, 4 }
 0x3d4   : > { %v2579_v61 = vmul.f32 0.5, %v2434_v60  ;;  %v2391_v62 = vpop.f32.mrf.mxu2  ;;  %v2405_v0 = vpop.f32.mrf.mxu3 }
 0x3d5   : > { %v2392_v1 = vadd.f32 %v2391_v62, %v1792_v58 }
 0x3d6   : > { %4035 = vtanh.f32 %v2579_v61 }
 0x3d7   : > { %v2406_v35 = vadd.f32 %v2405_v0, %v2392_v1  ;;  %v2421_v36 = vpop.f32.mrf.mxu0  ;;  %v2435_v2 = vpop.f32.mrf.mxu1 }
 0x3d8   : > { %v2422_v3 = vadd.f32 %v2421_v36, %v1793_v54 }
 0x3d9   : > { %v2578_v5 = vmul.f32 0.5, %v2406_v35 }
 0x3da   : > { %v2436_v6 = vadd.f32 %v2435_v2, %v2422_v3 }
 0x3db   : > { %4037 = vtanh.f32 %v2578_v5 }
 0x3dc   : > { %v2586_v7 = vmul.f32 0.5, %v2436_v6  ;;  %v2393_v8 = vpop.f32.mrf.mxu2  ;;  %v2407_v9 = vpop.f32.mrf.mxu3 }
 0x3dd   : > { %v4036_v53 = vpop.eup %4035  ;;  %v2394_v63 = vadd.f32 %v2393_v8, %v1792_v58 }
 0x3de   : > { %4039 = vtanh.f32 %v2586_v7  ;;  %v2607_v10 = vmul.f32 0.5, %v4036_v53 }
 0x3df   : > { %v2408_v48 = vadd.f32 %v2407_v9, %v2394_v63  ;;  %v2475_v37 = vpop.f32.mrf.mxu0  ;;  %v2489_v44 = vpop.f32.mrf.mxu1 }
 0x3e0   : > { %v2476_v11 = vadd.f32 %v2475_v37, %v1795_v4  ;;  %v2621_v16 = vadd.f32 0.5, %v2607_v10 }
 0x3e1   : > { %v4038_v59 = vpop.eup %4037  ;;  %v2585_v12 = vmul.f32 0.5, %v2408_v48 }
 0x3e2   : > { %v2606_v14 = vmul.f32 0.5, %v4038_v59  ;;  %v2490_v15 = vadd.f32 %v2489_v44, %v2476_v11 }
 0x3e3   : > { %4041 = vtanh.f32 %v2585_v12 }
 0x3e4   : > { %v2620_v17 = vadd.f32 0.5, %v2606_v14  ;;  %v2581_v18 = vmul.f32 0.5, %v2490_v15  ;;  %v2447_v19 = vpop.f32.mrf.mxu2  ;;  %v2461_v20 = vpop.f32.mrf.mxu3 }
 0x3e5   : > { %v4040_v21 = vpop.eup %4039  ;;  %v2448_v22 = vadd.f32 %v2447_v19, %v1794_v13 }
 0x3e6   : > { %v2634_v23 = vpack.c.bf16 %v2621_v16, %v2620_v17  ;;  %4043 = vtanh.f32 %v2581_v18  ;;  %v2614_v27 = vmul.f32 0.5, %v4040_v21 }
 0x3e7   : > { %v2462_v24 = vadd.f32 %v2461_v20, %v2448_v22  ;;  %v2477_v25 = vpop.f32.mrf.mxu0  ;;  %v2491_v26 = vpop.f32.mrf.mxu1 }
 0x3e8   : > { %2642 = vst [vmem:[%s5733_s17] sm:$0xff] %v2634_v23  ;;  %v2478_v28 = vadd.f32 %v2477_v25, %v1795_v4  ;;  %v2628_v33 = vadd.f32 0.5, %v2614_v27 }
 0x3e9   : > { %v4042_v29 = vpop.eup %4041  ;;  %v2580_v30 = vmul.f32 0.5, %v2462_v24 }
 0x3ea   : > { %v2613_v31 = vmul.f32 0.5, %v4042_v29  ;;  %v2492_v32 = vadd.f32 %v2491_v26, %v2478_v28  ;;  %v1798_v29 = vperm.slane %v5725_v52, 6 }
 0x3eb   : > { %4045 = vtanh.f32 %v2580_v30 }
 0x3ec   : > { %v2627_v34 = vadd.f32 0.5, %v2613_v31  ;;  %v2588_v38 = vmul.f32 0.5, %v2492_v32  ;;  %v2449_v39 = vpop.f32.mrf.mxu2  ;;  %v2463_v40 = vpop.f32.mrf.mxu3 }
 0x3ed   : > { %v4044_v41 = vpop.eup %4043  ;;  %v2450_v42 = vadd.f32 %v2449_v39, %v1794_v13 }
 0x3ee   : > { %v2638_v45 = vpack.c.bf16 %v2628_v33, %v2627_v34  ;;  %4047 = vtanh.f32 %v2588_v38  ;;  %v2609_v47 = vmul.f32 0.5, %v4044_v41 }
 0x3ef   : > { %v2464_v46 = vadd.f32 %v2463_v40, %v2450_v42 }
 0x3f0   : > { %2647 = vst [vmem:[%s5733_s17 + $0x1c] sm:$0xff] %v2638_v45  ;;  %v2623_v60 = vadd.f32 0.5, %v2609_v47 }
 0x3f1   : > { %v2531_v49 = vpop.f32.mrf.mxu0  ;;  %v2545_v50 = vpop.f32.mrf.mxu1  ;;  %v2587_v54 = vmul.f32 0.5, %v2464_v46 }
 0x3f2   : > { %v4046_v51 = vpop.eup %4045  ;;  %v2532_v55 = vadd.f32 %v2531_v49, %v1797_v43 }
 0x3f3   : > { %v2608_v56 = vmul.f32 0.5, %v4046_v51  ;;  %4049 = vtanh.f32 %v2587_v54 }
 0x3f4   : > { %v2546_v58 = vadd.f32 %v2545_v50, %v2532_v55  ;;  %v4048_v62 = vpop.eup %4047 }
 0x3f5   : > { %v2622_v61 = vadd.f32 0.5, %v2608_v56  ;;  %v2503_v1 = vpop.f32.mrf.mxu2  ;;  %v2517_v35 = vpop.f32.mrf.mxu3  ;;  %v2616_v3 = vmul.f32 0.5, %v4048_v62 }
 0x3f6   : > { %v2583_v0 = vmul.f32 0.5, %v2546_v58  ;;  %v2504_v2 = vadd.f32 %v2503_v1, %v1796_v57 }
 0x3f7   : > { %v2635_v36 = vpack.c.bf16 %v2623_v60, %v2622_v61  ;;  %v2630_v48 = vadd.f32 0.5, %v2616_v3 }
 0x3f8   : > { %4051 = vtanh.f32 %v2583_v0  ;;  %v2518_v5 = vadd.f32 %v2517_v35, %v2504_v2 }
 0x3f9   : > { %2643 = vst [vmem:[%s5733_s17 + $0x8] sm:$0xff] %v2635_v36  ;;  %v2533_v6 = vpop.f32.mrf.mxu0  ;;  %v4050_v7 = vpop.eup %4049 }
 0x3fa   : > { %v2534_v8 = vadd.f32 %v2533_v6, %v1797_v43  ;;  %v2615_v9 = vmul.f32 0.5, %v4050_v7  ;;  %v2582_v4 = vmul.f32 0.5, %v2518_v5  ;;  %v2547_v53 = vpop.f32.mrf.mxu1 }
 0x3fc   : > { %v2548_v63 = vadd.f32 %v2547_v53, %v2534_v8  ;;  %v2629_v37 = vadd.f32 0.5, %v2615_v9  ;;  %4053 = vtanh.f32 %v2582_v4 }
 0x3fd   : > { %v2505_v10 = vpop.f32.mrf.mxu2  ;;  %v2519_v13 = vpop.f32.mrf.mxu3 }
 0x3fe   : > { %v2590_v44 = vmul.f32 0.5, %v2548_v63  ;;  %v4052_v11 = vpop.eup %4051  ;;  %v2639_v59 = vpack.c.bf16 %v2630_v48, %v2629_v37  ;;  %v2506_v12 = vadd.f32 %v2505_v10, %v1796_v57 }
 0x3ff   : > { %v2611_v15 = vmul.f32 0.5, %v4052_v11 }
 0x400   : > { %2648 = vst [vmem:[%s5733_s17 + $0x24] sm:$0xff] %v2639_v59  ;;  %4055 = vtanh.f32 %v2590_v44  ;;  %v2520_v14 = vadd.f32 %v2519_v13, %v2506_v12 }
 0x401   : > { %v2625_v19 = vadd.f32 0.5, %v2611_v15 }
 0x402   : > { %v4054_v16 = vpop.eup %4053  ;;  %v2589_v17 = vmul.f32 0.5, %v2520_v14 }
 0x403   : > { %v2610_v18 = vmul.f32 0.5, %v4054_v16 }
 0x404   : > { %4057 = vtanh.f32 %v2589_v17 }
 0x405   : > { %v2624_v20 = vadd.f32 0.5, %v2610_v18 }
 0x406   : > { %v4056_v21 = vpop.eup %4055 }
 0x407   : > { %v2636_v22 = vpack.c.bf16 %v2625_v19, %v2624_v20  ;;  %v2618_v23 = vmul.f32 0.5, %v4056_v21 }
 0x409   : > { %2644 = vst [vmem:[%s5733_s17 + $0x10] sm:$0xff] %v2636_v22  ;;  %v2632_v26 = vadd.f32 0.5, %v2618_v23 }
 0x40a   : > { %v4058_v24 = vpop.eup %4057 }
 0x40b   : > { %v2617_v25 = vmul.f32 0.5, %v4058_v24 }
 0x40d   : > { %v2631_v27 = vadd.f32 0.5, %v2617_v25 }
 0x40f   : > { %v2640_v28 = vpack.c.bf16 %v2632_v26, %v2631_v27 }
 0x411   : > { %2649 = vst [vmem:[%s5733_s17 + $0x2c] sm:$0xff] %v2640_v28 }
 0x415   : > { %v2559_v30 = vpop.f32.mrf.mxu2  ;;  %v2573_v31 = vpop.f32.mrf.mxu3 }
 0x416   : > { %v2560_v32 = vadd.f32 %v2559_v30, %v1798_v29 }
 0x418   : > { %v2574_v33 = vadd.f32 %v2573_v31, %v2560_v32 }
 0x41a   : > { %v2584_v34 = vmul.f32 0.5, %v2574_v33 }
 0x41c   : > { %4059 = vtanh.f32 %v2584_v34 }
 0x41d   : > { %v2561_v38 = vpop.f32.mrf.mxu2  ;;  %v2575_v40 = vpop.f32.mrf.mxu3 }
 0x41e   : > { %v2562_v39 = vadd.f32 %v2561_v38, %v1798_v29 }
 0x420   : > { %v2576_v41 = vadd.f32 %v2575_v40, %v2562_v39 }
 0x422   : > { %v4060_v42 = vpop.eup %4059  ;;  %v2591_v43 = vmul.f32 0.5, %v2576_v41 }
 0x423   : > { %v2612_v45 = vmul.f32 0.5, %v4060_v42 }
 0x424   : > { %4061 = vtanh.f32 %v2591_v43 }
 0x425   : > { %v2626_v46 = vadd.f32 0.5, %v2612_v45 }
 0x427   : > { %v2637_v52 = vpack.c.bf16 %v2626_v46, %v2626_v46 }
 0x429   : > { %2646 = vst.msk [vmem:[%s5733_s17 + $0x18] sm:$0xf] %vm2645_vm2, %v2637_v52 }
 0x42a   : > { %v4062_v47 = vpop.eup %4061 }
 0x42b   : > { %v2619_v49 = vmul.f32 0.5, %v4062_v47 }
 0x42d   : > { %v2633_v50 = vadd.f32 0.5, %v2619_v49  ;;  %2658 = sbr.rel (!%p4249_p5) target bundleno = 1110 (0x456), region = 76 }
 0x42f   : > { %v2641_v51 = vpack.c.bf16 %v2633_v50, %v2633_v50 }
 0x431   : > { %2650 = vst.msk [vmem:[%s5733_s17 + $0x34] sm:$0xf] %vm2645_vm2, %v2641_v51 }
 0x432   : > { %s5845_s23 = smov (!%p2661_p11, %s2660_s23), 2 }
 0x433   : > { %s3736_s21 = smul.u32 28, %s5845_s23 }
 0x435   : > { %s2665_s19 = ssub.s32 56, %s3736_s21 }
 0x436   : > { %s2666_s30 = sshll.u32 %s2665_s19, 4 }
 0x437   : > { %2667 = vsyncadd %s5748_s22, %s2666_s30  ;;  %p5754_p12 = scmp.ne.s32.totalorder %s3736_s21, 0  ;;  %s3991_s20 = smul.u32 56, %s4232_s29 }
 0x438   : > { %s2673_s24 = sshll.u32 %s5733_s17, 4  ;;  %s5760_s18 = smul.u32 448, %s5845_s23  ;;  %s5765_s24 = int_to_ptr.vmem [resolvable:$true] %s2673_s24 }
 0x439   : > { %s2671_s15 = scalar_lea.hbm %s5819_s13, %s3991_s20  ;;  %s4063_s21 = sshra.s32 %s5765_s24, 4  ;;  %s4064_s21 = int_to_ptr.vmem [resolvable:$true] %s4063_s21 }
 0x43a   : > { %s2675_s16 = sshll.u32 %s2671_s15, 4  ;;  %s4065_s19 = sshrl.u32 %s5760_s18, 4  ;;  %s5767_s16 = int_to_ptr.hbm [resolvable:$true] %s2675_s16 }
 0x43b   : > { %s4101_s29 = sshll.u32 %s4065_s19, 4  ;;  %s4068_s17 = sadd.s32 1, %s4065_s19 }
 0x43c   : > { %p4067_p13 = scmp.ne.s32.totalorder %s4101_s29, %s5760_s18  ;;  %s4138_s30 = smov [#allocation2]  }
 0x43d   : > { %s4074_s20 = scalar_lea.vmem %s4138_s30, 112 }
 0x43e   : > { %s5847_s17 = smov (!%p4067_p13, %s4068_s17), %s4065_s19 }
 0x43f   : > { %s4070_s23 = scalar_lea.vmem %s4064_s21, %s5847_s17 }
 0x440   : > { %p4071_p0 = scmp.ne.s32.totalorder %s4064_s21, %s4070_s23  ;;  %p4076_p3 = scmp.lt.s32.totalorder %s4074_s20, %s4070_s23 }
 0x442   : > { %p4072_p1 = pnand %p4071_p0, %p5754_p12 }
 0x444   : > { %p4073_p2 = pneg %p4072_p1 }
 0x446   : > { %p4078_p4 = pnand %p4076_p3, %p4073_p2 }
 0x448   : > { %4081 = shalt.err (!%p4078_p4)
}
 0x449   : > { %s4082_s14 = sshra.s32 %s5767_s16, 4  ;;  %s4093_s21 = scalar_lea.hbm %s5819_s13, 84  ;;  %s4083_s14 = int_to_ptr.hbm [resolvable:$true] %s4082_s14 }
 0x44a   : > { %s4089_s25 = scalar_lea.hbm %s4083_s14, %s5847_s17  ;;  %p4094_p9 = scmp.lt.s32.totalorder %s4083_s14, %s5819_s13 }
 0x44b   : > { %p4090_p5 = scmp.ne.s32.totalorder %s4083_s14, %s4089_s25  ;;  %p4095_p10 = scmp.lt.s32.totalorder %s4093_s21, %s4089_s25 }
 0x44d   : > { %p4091_p7 = pnand %p4090_p5, %p5754_p12  ;;  %p4096_p11 = por %p4095_p10, %p4094_p9 }
 0x44f   : > { %p4092_p8 = pneg %p4091_p7 }
 0x451   : > { %p4097_p13 = pnand %p4096_p11, %p4092_p8 }
 0x453   : > { %4100 = shalt.err (!%p4097_p13)
}
 0x454   : > { %s4139_s23 = smov 448   ;;  %s4140_s17 = smov 28  }
 0x455   : > { %2681 = dma.vmem_to_hbm [thread:$0]  (%p5754_p12), %s5765_s24, %s5760_s18, %s5767_s16, %s5748_s22, %s4139_s23, %s4139_s23, %s4140_s17  }
 0x456 PF: > { %s5837_s30 = sld [smem:[#allocation5_spill]]  ;;  %p3997_p0 = scmp.ge.s32.totalorder %s4136_s28, 2 }
 0x458   : > { %p3994_p1 = pnand %p3997_p0, %p4253_p6 }
 0x45a   : > { %p3995_p2 = pneg %p3994_p1 }
 0x45c   : > { %s2690_s0 = sand.u32 1, %s5837_s30  }
 0x45d   : > { %s2691_s14 = scalar_lea.sflag [#allocation3], %s2690_s0 }
 0x45e   : > { %4119 = dma.done.wait (%p3995_p2), %s2691_s14, 896  }
 0x45f   : > { %4121 = vsyncadd (%p3995_p2), %s2691_s14, 4294966400  ;;  %s5839_s28 = sld [smem:[#allocation7_spill]]  ;;  %s5842_s25 = smov %s4128_s26 }
 0x460   : > { %s5840_s15 = sld [smem:[#allocation6_spill]] }
 0x461   : > { %s5841_s27 = sld [smem:[#allocation8_spill]] }
 0x465   : > { %p23_p3 = scmp.ge.s32.totalorder %s5839_s28, 4  }
 0x466   : > { %s5843_s26 = smov %s5840_s15 }
 0x467   :  { %25 = sbr.rel (!%p23_p3) target bundleno = 5 (0x5), region = 107 }
 0x46c   :  { %2697 = vsyncpa [#allocation3], 1 }
 0x46d   :  { %2699 = vsyncpa [#allocation3 + $0x1], 1 }

</bundles_post_ra>
